<compile_context>
chip_gen: v6e
topology: v6e:2x2x1
jax: 0.10.0
libtpu: 0.0.40
codegen_flags: <defaults>
</compile_context>

<pallas_src>
import jax
import jax.numpy as jnp
from jax.experimental import pallas as pl
from jax.experimental.pallas import tpu as pltpu

n_embd = 384                       # fixed by the module
num_heads = 6
head_size = n_embd // num_heads    # 64
block_size = 256


def _pick_block_batch(B: int) -> int:
    """Largest Bb in {8,4,2,1} dividing B while keeping >= 2 grid steps."""
    for bb in (8, 4, 2, 1):
        if B % bb == 0 and B // bb >= 2:
            return bb
    return B


# ----------------------------------------------------------------------------
# Fused kernel: Bb batch elements per grid step.
#   x_ref    : (Bb, T, C)
#   wqkv_ref : (C, 3C)   columns = [q heads | k heads | v heads], hs per head;
#                        Q columns pre-scaled by n_embd**-0.5.
#   wproj_ref: (C, C)
#   bproj_ref: (1, C)
#   o_ref    : (Bb, T, C)
#   qkv_ref  : VMEM scratch (Bb*T, 3C) in the input dtype
#   acc_ref  : VMEM scratch (Bb*T, C) f32 — output-projection accumulator
# ----------------------------------------------------------------------------
def mha_fused_kernel(x_ref, wqkv_ref, wproj_ref, bproj_ref, o_ref,
                     qkv_ref, acc_ref):
    in_dtype = x_ref.dtype
    Bb, T, C = x_ref.shape
    hs = head_size

    # Fused QKV projection on the flattened (Bb*T, C) slab; written once to
    # VMEM scratch in the input dtype (single cast pass).
    x2 = x_ref[...].reshape(Bb * T, C)
    qkv_ref[...] = jnp.dot(
        x2, wqkv_ref[...], preferred_element_type=jnp.float32).astype(in_dtype)

    # Causal mask, shared by all heads / batch elements in the block.
    row = jax.lax.broadcasted_iota(jnp.int32, (T, T), 0)
    col = jax.lax.broadcasted_iota(jnp.int32, (T, T), 1)
    causal = col <= row

    for h in range(num_heads):                  # static, 6 iterations
        lo = h * hs
        wph = wproj_ref[lo:lo + hs, :]          # (hs, C), sublane-aligned slice
        for b in range(Bb):                     # static, small
            r0 = b * T
            q = qkv_ref[r0:r0 + T, lo:lo + hs]                   # (T, hs) scaled
            k = qkv_ref[r0:r0 + T, C + lo:C + lo + hs]           # (T, hs)
            v = qkv_ref[r0:r0 + T, 2 * C + lo:2 * C + lo + hs]   # (T, hs)

            # q @ k^T on the MXU with f32 accumulation.
            wei = jax.lax.dot_general(
                q, k, (((1,), (1,)), ((), ())),
                preferred_element_type=jnp.float32)              # (T, T)
            wei = jnp.where(causal, wei, -jnp.inf)

            # Numerically stable softmax in f32 (v5e-safe); normalise AFTER
            # the PV matmul (hs lanes/row instead of T).
            wei = wei - jnp.max(wei, axis=-1, keepdims=True)
            p = jnp.exp(wei)
            inv = pl.reciprocal(jnp.sum(p, axis=-1, keepdims=True), approx=True)

            oh = jnp.dot(p.astype(in_dtype), v,
                         preferred_element_type=jnp.float32)     # (T, hs) f32
            oh = (oh * inv).astype(in_dtype)

            # Accumulate this head's contribution to the output projection.
            contrib = jnp.dot(oh, wph, preferred_element_type=jnp.float32)
            if h == 0:
                acc_ref[r0:r0 + T, :] = contrib
            else:
                acc_ref[r0:r0 + T, :] += contrib

    # Bias add + lane-dense (Bb, T, C) store in the (B, T, C) layout.
    y = acc_ref[...] + bproj_ref[...].astype(jnp.float32)
    o_ref[...] = y.reshape(Bb, T, C).astype(o_ref.dtype)


def multi_head_attention(x, wq, wk, wv, w_proj, b_proj):
    """x: (B,T,C); wq/wk/wv: (H,C,hs); w_proj: (C,C); b_proj: (1,C)."""
    B, T, C = x.shape
    H, _, hs = wq.shape
    assert H * hs == C and T <= block_size
    assert H == num_heads and hs == head_size and C == n_embd

    # Weight packing (could be pre-baked at parameter-load time):
    # (H, C, hs) -> (C, H*hs), column block h == head h, then [Q | K | V].
    # NOTE: scale = C**-0.5 = n_embd**-0.5, exactly as the PyTorch module.
    # Everything is pinned to x.dtype so the MXU sees uniform operands
    # (bf16 stays bf16; no silent f32 promotion).
    scale = float(C) ** -0.5

    def stack(w):
        return jnp.transpose(w, (1, 0, 2)).reshape(C, H * hs)

    wqkv = jnp.concatenate(
        [stack(wq) * scale, stack(wk), stack(wv)], axis=-1).astype(x.dtype)
    w_proj = w_proj.astype(x.dtype)

    Bb = _pick_block_batch(B)
    grid = (B // Bb,)

    out = pl.pallas_call(
        mha_fused_kernel,
        out_shape=jax.ShapeDtypeStruct((B, T, C), x.dtype),
        grid=grid,
        in_specs=[
            pl.BlockSpec((Bb, T, C), lambda b: (b, 0, 0)),
            pl.BlockSpec((C, 3 * C), lambda b: (0, 0)),
            pl.BlockSpec((C, C), lambda b: (0, 0)),
            pl.BlockSpec((1, C), lambda b: (0, 0)),
        ],
        out_specs=pl.BlockSpec((Bb, T, C), lambda b: (b, 0, 0)),
        scratch_shapes=[
            pltpu.VMEM((Bb * T, 3 * C), x.dtype),     # qkv (input dtype)
            pltpu.VMEM((Bb * T, C), jnp.float32),     # output-proj accumulator
        ],
        compiler_params=pltpu.CompilerParams(
            dimension_semantics=("parallel",),        # megacore / 2-TC sharding
            vmem_limit_bytes=48 * 1024 * 1024,        # sized to use, < v7x 64 MiB
        ),
    )(x, wqkv, w_proj, b_proj)

    return out


# Pure-JAX reference (eval-mode dropout) for sanity checking.
def reference(x, wq, wk, wv, w_proj, b_proj):
    B, T, C = x.shape
    scale = C ** -0.5
    outs = []
    for h in range(wq.shape[0]):
        q = x @ wq[h]
        k = x @ wk[h]
        v = x @ wv[h]
        wei = (q @ jnp.swapaxes(k, -2, -1)) * scale
        mask = jnp.tril(jnp.ones((T, T), dtype=bool))
        wei = jnp.where(mask, wei, -jnp.inf)
        wei = jax.nn.softmax(wei, axis=-1)
        outs.append(wei @ v)
    cat = jnp.concatenate(outs, axis=-1)
    return cat @ w_proj + b_proj[0]


if __name__ == "__main__":
    key = jax.random.PRNGKey(0)
    kx, kq, kk, kv, kp, kb = jax.random.split(key, 6)

    wq = jax.random.normal(kq, (num_heads, n_embd, head_size), jnp.float32) * 0.02
    wk = jax.random.normal(kk, (num_heads, n_embd, head_size), jnp.float32) * 0.02
    wv = jax.random.normal(kv, (num_heads, n_embd, head_size), jnp.float32) * 0.02
    w_proj = jax.random.normal(kp, (n_embd, n_embd), jnp.float32) * 0.02
    b_proj = jax.random.normal(kb, (1, n_embd), jnp.float32) * 0.02

    # Case 1: B=2, T=8 -> Bb=1, grid=(2,)
    x1 = jax.random.normal(kx, (2, 8, n_embd), dtype=jnp.float32)
    out1 = jax.block_until_ready(multi_head_attention(x1, wq, wk, wv, w_proj, b_proj))
    ref1 = reference(x1, wq, wk, wv, w_proj, b_proj)
    assert out1.shape == (2, 8, n_embd)
    # Tolerance accounts for the approx (EUP) softmax reciprocal.
    assert jnp.allclose(out1, ref1, atol=2e-3, rtol=2e-3), "mismatch vs reference (case 1)"

    # Case 2: B=4, T=16 -> Bb=2, grid=(2,)  (exercises the multi-batch block path)
    x2 = jax.random.normal(jax.random.fold_in(kx, 1), (4, 16, n_embd), jnp.float32)
    out2 = jax.block_until_ready(multi_head_attention(x2, wq, wk, wv, w_proj, b_proj))
    ref2 = reference(x2, wq, wk, wv, w_proj, b_proj)
    assert out2.shape == (4, 16, n_embd)
    assert jnp.allclose(out2, ref2, atol=2e-3, rtol=2e-3), "mismatch vs reference (case 2)"

    print("KERNEL_OK")
</pallas_src>

<mosaic_0001>
module attributes {stable_mosaic.version = 11 : i64} {
  func.func @mha_fused_kernel(%arg0: i32, %arg1: memref<1x8x384xf32, #tpu.memory_space<vmem>>, %arg2: memref<384x1152xf32, #tpu.memory_space<vmem>>, %arg3: memref<384x384xf32, #tpu.memory_space<vmem>>, %arg4: memref<1x384xf32, #tpu.memory_space<vmem>>, %arg5: memref<1x8x384xf32, #tpu.memory_space<vmem>>, %arg6: memref<8x1152xf32, #tpu.memory_space<vmem>>, %arg7: memref<8x384xf32, #tpu.memory_space<vmem>>) attributes {dimension_semantics = [#tpu.dimension_semantics<parallel>], iteration_bounds = array<i64: 2>, scalar_prefetch = 0 : i64, scratch_operands = 2 : i64, tpu.core_type = #tpu.core_type<tc>, window_params = [{transform_indices = @transform_0, window_bounds = array<i64: 1, 8, 384>}, {pipeline_mode = #tpu.pipeline_mode<synchronous>, transform_indices = @transform_1, window_bounds = array<i64: 384, 1152>}, {pipeline_mode = #tpu.pipeline_mode<synchronous>, transform_indices = @transform_2, window_bounds = array<i64: 384, 384>}, {pipeline_mode = #tpu.pipeline_mode<synchronous>, transform_indices = @transform_3, window_bounds = array<i64: 1, 384>}, {transform_indices = @transform_4, window_bounds = array<i64: 1, 8, 384>}]} {
    %c0 = arith.constant 0 : index
    %c0_0 = arith.constant 0 : index
    %c0_1 = arith.constant 0 : index
    %0 = vector.load %arg1[%c0, %c0_0, %c0_1] : memref<1x8x384xf32, #tpu.memory_space<vmem>>, vector<1x8x384xf32>
    %1 = vector.shape_cast %0 : vector<1x8x384xf32> to vector<8x384xf32>
    %c0_2 = arith.constant 0 : index
    %c0_3 = arith.constant 0 : index
    %2 = vector.load %arg2[%c0_2, %c0_3] : memref<384x1152xf32, #tpu.memory_space<vmem>>, vector<384x1152xf32>
    %cst = arith.constant dense<0.000000e+00> : vector<8x1152xf32>
    %3 = tpu.matmul %1, %2, %cst {dimension_numbers = #tpu.dot_dimension_numbers<[1], [0], [0], [1], [0, 0, 1, 1], [], []>} : vector<8x384xf32>, vector<384x1152xf32>, vector<8x1152xf32> -> vector<8x1152xf32>
    %c0_4 = arith.constant 0 : index
    %c0_5 = arith.constant 0 : index
    %4 = vector.load %arg6[%c0_4, %c0_5] : memref<8x1152xf32, #tpu.memory_space<vmem>>, vector<8x1152xf32>
    tpu.vector_store %arg6[%c0_4, %c0_5], %3 {strides = array<i32>} : memref<8x1152xf32, #tpu.memory_space<vmem>>, vector<8x1152xf32>,
    %5 = tpu.iota {dimensions = array<i32: 0>} : vector<8x8xi32>
    %6 = tpu.iota {dimensions = array<i32: 1>} : vector<8x8xi32>
    %7 = arith.cmpi sle, %6, %5 : vector<8x8xi32>
    %c0_6 = arith.constant 0 : index
    %c0_7 = arith.constant 0 : index
    %8 = vector.load %arg3[%c0_6, %c0_7] : memref<384x384xf32, #tpu.memory_space<vmem>>, vector<64x384xf32>
    %c0_8 = arith.constant 0 : index
    %c0_9 = arith.constant 0 : index
    %9 = vector.load %arg6[%c0_8, %c0_9] : memref<8x1152xf32, #tpu.memory_space<vmem>>, vector<8x64xf32>
    %c0_10 = arith.constant 0 : index
    %c384 = arith.constant 384 : index
    %10 = vector.load %arg6[%c0_10, %c384] : memref<8x1152xf32, #tpu.memory_space<vmem>>, vector<8x64xf32>
    %c0_11 = arith.constant 0 : index
    %c768 = arith.constant 768 : index
    %11 = vector.load %arg6[%c0_11, %c768] : memref<8x1152xf32, #tpu.memory_space<vmem>>, vector<8x64xf32>
    %cst_12 = arith.constant dense<0.000000e+00> : vector<8x8xf32>
    %12 = tpu.matmul %9, %10, %cst_12 {dimension_numbers = #tpu.dot_dimension_numbers<[1], [1], [0], [0], [0, 0, 1, 0], [], []>} : vector<8x64xf32>, vector<8x64xf32>, vector<8x8xf32> -> vector<8x8xf32>
    %cst_13 = arith.constant 0xFF800000 : f32
    %13 = vector.broadcast %cst_13 : f32 to vector<8x8xf32>
    %14 = arith.select %7, %12, %13 : vector<8x8xi1>, vector<8x8xf32>
    %cst_14 = arith.constant dense<0xFF800000> : vector<8xf32>
    %15 = vector.multi_reduction <maximumf>, %14, %cst_14 [1] : vector<8x8xf32> to vector<8xf32>
    %16 = vector.shape_cast %15 : vector<8xf32> to vector<8x1xf32>
    %17 = vector.broadcast %16 : vector<8x1xf32> to vector<8x8xf32>
    %18 = arith.subf %14, %17 : vector<8x8xf32>
    %19 = math.exp %18 : vector<8x8xf32>
    %cst_15 = arith.constant dense<0.000000e+00> : vector<8xf32>
    %20 = vector.multi_reduction <add>, %19, %cst_15 [1] : vector<8x8xf32> to vector<8xf32>
    %21 = vector.shape_cast %20 : vector<8xf32> to vector<8x1xf32>
    %22 = tpu.reciprocal %21 {approx = true} : vector<8x1xf32> -> vector<8x1xf32>
    %cst_16 = arith.constant dense<0.000000e+00> : vector<8x64xf32>
    %23 = tpu.matmul %19, %11, %cst_16 {dimension_numbers = #tpu.dot_dimension_numbers<[1], [0], [0], [1], [0, 0, 1, 1], [], []>} : vector<8x8xf32>, vector<8x64xf32>, vector<8x64xf32> -> vector<8x64xf32>
    %24 = vector.broadcast %22 : vector<8x1xf32> to vector<8x64xf32>
    %25 = arith.mulf %23, %24 : vector<8x64xf32>
    %cst_17 = arith.constant dense<0.000000e+00> : vector<8x384xf32>
    %26 = tpu.matmul %25, %8, %cst_17 {dimension_numbers = #tpu.dot_dimension_numbers<[1], [0], [0], [1], [0, 0, 1, 1], [], []>} : vector<8x64xf32>, vector<64x384xf32>, vector<8x384xf32> -> vector<8x384xf32>
    %c0_18 = arith.constant 0 : index
    %c0_19 = arith.constant 0 : index
    %27 = vector.load %arg7[%c0_18, %c0_19] : memref<8x384xf32, #tpu.memory_space<vmem>>, vector<8x384xf32>
    tpu.vector_store %arg7[%c0_18, %c0_19], %26 {strides = array<i32>} : memref<8x384xf32, #tpu.memory_space<vmem>>, vector<8x384xf32>,
    %c64 = arith.constant 64 : index
    %c0_20 = arith.constant 0 : index
    %28 = vector.load %arg3[%c64, %c0_20] : memref<384x384xf32, #tpu.memory_space<vmem>>, vector<64x384xf32>
    %c0_21 = arith.constant 0 : index
    %c64_22 = arith.constant 64 : index
    %29 = vector.load %arg6[%c0_21, %c64_22] : memref<8x1152xf32, #tpu.memory_space<vmem>>, vector<8x64xf32>
    %c0_23 = arith.constant 0 : index
    %c448 = arith.constant 448 : index
    %30 = vector.load %arg6[%c0_23, %c448] : memref<8x1152xf32, #tpu.memory_space<vmem>>, vector<8x64xf32>
    %c0_24 = arith.constant 0 : index
    %c832 = arith.constant 832 : index
    %31 = vector.load %arg6[%c0_24, %c832] : memref<8x1152xf32, #tpu.memory_space<vmem>>, vector<8x64xf32>
    %cst_25 = arith.constant dense<0.000000e+00> : vector<8x8xf32>
    %32 = tpu.matmul %29, %30, %cst_25 {dimension_numbers = #tpu.dot_dimension_numbers<[1], [1], [0], [0], [0, 0, 1, 0], [], []>} : vector<8x64xf32>, vector<8x64xf32>, vector<8x8xf32> -> vector<8x8xf32>
    %cst_26 = arith.constant 0xFF800000 : f32
    %33 = vector.broadcast %cst_26 : f32 to vector<8x8xf32>
    %34 = arith.select %7, %32, %33 : vector<8x8xi1>, vector<8x8xf32>
    %cst_27 = arith.constant dense<0xFF800000> : vector<8xf32>
    %35 = vector.multi_reduction <maximumf>, %34, %cst_27 [1] : vector<8x8xf32> to vector<8xf32>
    %36 = vector.shape_cast %35 : vector<8xf32> to vector<8x1xf32>
    %37 = vector.broadcast %36 : vector<8x1xf32> to vector<8x8xf32>
    %38 = arith.subf %34, %37 : vector<8x8xf32>
    %39 = math.exp %38 : vector<8x8xf32>
    %cst_28 = arith.constant dense<0.000000e+00> : vector<8xf32>
    %40 = vector.multi_reduction <add>, %39, %cst_28 [1] : vector<8x8xf32> to vector<8xf32>
    %41 = vector.shape_cast %40 : vector<8xf32> to vector<8x1xf32>
    %42 = tpu.reciprocal %41 {approx = true} : vector<8x1xf32> -> vector<8x1xf32>
    %cst_29 = arith.constant dense<0.000000e+00> : vector<8x64xf32>
    %43 = tpu.matmul %39, %31, %cst_29 {dimension_numbers = #tpu.dot_dimension_numbers<[1], [0], [0], [1], [0, 0, 1, 1], [], []>} : vector<8x8xf32>, vector<8x64xf32>, vector<8x64xf32> -> vector<8x64xf32>
    %44 = vector.broadcast %42 : vector<8x1xf32> to vector<8x64xf32>
    %45 = arith.mulf %43, %44 : vector<8x64xf32>
    %cst_30 = arith.constant dense<0.000000e+00> : vector<8x384xf32>
    %46 = tpu.matmul %45, %28, %cst_30 {dimension_numbers = #tpu.dot_dimension_numbers<[1], [0], [0], [1], [0, 0, 1, 1], [], []>} : vector<8x64xf32>, vector<64x384xf32>, vector<8x384xf32> -> vector<8x384xf32>
    %c0_31 = arith.constant 0 : index
    %c0_32 = arith.constant 0 : index
    %47 = vector.load %arg7[%c0_31, %c0_32] : memref<8x384xf32, #tpu.memory_space<vmem>>, vector<8x384xf32>
    %48 = arith.addf %47, %46 : vector<8x384xf32>
    %c0_33 = arith.constant 0 : index
    %c0_34 = arith.constant 0 : index
    %49 = vector.load %arg7[%c0_33, %c0_34] : memref<8x384xf32, #tpu.memory_space<vmem>>, vector<8x384xf32>
    tpu.vector_store %arg7[%c0_33, %c0_34], %48 {strides = array<i32>} : memref<8x384xf32, #tpu.memory_space<vmem>>, vector<8x384xf32>,
    %c128 = arith.constant 128 : index
    %c0_35 = arith.constant 0 : index
    %50 = vector.load %arg3[%c128, %c0_35] : memref<384x384xf32, #tpu.memory_space<vmem>>, vector<64x384xf32>
    %c0_36 = arith.constant 0 : index
    %c128_37 = arith.constant 128 : index
    %51 = vector.load %arg6[%c0_36, %c128_37] : memref<8x1152xf32, #tpu.memory_space<vmem>>, vector<8x64xf32>
    %c0_38 = arith.constant 0 : index
    %c512 = arith.constant 512 : index
    %52 = vector.load %arg6[%c0_38, %c512] : memref<8x1152xf32, #tpu.memory_space<vmem>>, vector<8x64xf32>
    %c0_39 = arith.constant 0 : index
    %c896 = arith.constant 896 : index
    %53 = vector.load %arg6[%c0_39, %c896] : memref<8x1152xf32, #tpu.memory_space<vmem>>, vector<8x64xf32>
    %cst_40 = arith.constant dense<0.000000e+00> : vector<8x8xf32>
    %54 = tpu.matmul %51, %52, %cst_40 {dimension_numbers = #tpu.dot_dimension_numbers<[1], [1], [0], [0], [0, 0, 1, 0], [], []>} : vector<8x64xf32>, vector<8x64xf32>, vector<8x8xf32> -> vector<8x8xf32>
    %cst_41 = arith.constant 0xFF800000 : f32
    %55 = vector.broadcast %cst_41 : f32 to vector<8x8xf32>
    %56 = arith.select %7, %54, %55 : vector<8x8xi1>, vector<8x8xf32>
    %cst_42 = arith.constant dense<0xFF800000> : vector<8xf32>
    %57 = vector.multi_reduction <maximumf>, %56, %cst_42 [1] : vector<8x8xf32> to vector<8xf32>
    %58 = vector.shape_cast %57 : vector<8xf32> to vector<8x1xf32>
    %59 = vector.broadcast %58 : vector<8x1xf32> to vector<8x8xf32>
    %60 = arith.subf %56, %59 : vector<8x8xf32>
    %61 = math.exp %60 : vector<8x8xf32>
    %cst_43 = arith.constant dense<0.000000e+00> : vector<8xf32>
    %62 = vector.multi_reduction <add>, %61, %cst_43 [1] : vector<8x8xf32> to vector<8xf32>
    %63 = vector.shape_cast %62 : vector<8xf32> to vector<8x1xf32>
    %64 = tpu.reciprocal %63 {approx = true} : vector<8x1xf32> -> vector<8x1xf32>
    %cst_44 = arith.constant dense<0.000000e+00> : vector<8x64xf32>
    %65 = tpu.matmul %61, %53, %cst_44 {dimension_numbers = #tpu.dot_dimension_numbers<[1], [0], [0], [1], [0, 0, 1, 1], [], []>} : vector<8x8xf32>, vector<8x64xf32>, vector<8x64xf32> -> vector<8x64xf32>
    %66 = vector.broadcast %64 : vector<8x1xf32> to vector<8x64xf32>
    %67 = arith.mulf %65, %66 : vector<8x64xf32>
    %cst_45 = arith.constant dense<0.000000e+00> : vector<8x384xf32>
    %68 = tpu.matmul %67, %50, %cst_45 {dimension_numbers = #tpu.dot_dimension_numbers<[1], [0], [0], [1], [0, 0, 1, 1], [], []>} : vector<8x64xf32>, vector<64x384xf32>, vector<8x384xf32> -> vector<8x384xf32>
    %c0_46 = arith.constant 0 : index
    %c0_47 = arith.constant 0 : index
    %69 = vector.load %arg7[%c0_46, %c0_47] : memref<8x384xf32, #tpu.memory_space<vmem>>, vector<8x384xf32>
    %70 = arith.addf %69, %68 : vector<8x384xf32>
    %c0_48 = arith.constant 0 : index
    %c0_49 = arith.constant 0 : index
    %71 = vector.load %arg7[%c0_48, %c0_49] : memref<8x384xf32, #tpu.memory_space<vmem>>, vector<8x384xf32>
    tpu.vector_store %arg7[%c0_48, %c0_49], %70 {strides = array<i32>} : memref<8x384xf32, #tpu.memory_space<vmem>>, vector<8x384xf32>,
    %c192 = arith.constant 192 : index
    %c0_50 = arith.constant 0 : index
    %72 = vector.load %arg3[%c192, %c0_50] : memref<384x384xf32, #tpu.memory_space<vmem>>, vector<64x384xf32>
    %c0_51 = arith.constant 0 : index
    %c192_52 = arith.constant 192 : index
    %73 = vector.load %arg6[%c0_51, %c192_52] : memref<8x1152xf32, #tpu.memory_space<vmem>>, vector<8x64xf32>
    %c0_53 = arith.constant 0 : index
    %c576 = arith.constant 576 : index
    %74 = vector.load %arg6[%c0_53, %c576] : memref<8x1152xf32, #tpu.memory_space<vmem>>, vector<8x64xf32>
    %c0_54 = arith.constant 0 : index
    %c960 = arith.constant 960 : index
    %75 = vector.load %arg6[%c0_54, %c960] : memref<8x1152xf32, #tpu.memory_space<vmem>>, vector<8x64xf32>
    %cst_55 = arith.constant dense<0.000000e+00> : vector<8x8xf32>
    %76 = tpu.matmul %73, %74, %cst_55 {dimension_numbers = #tpu.dot_dimension_numbers<[1], [1], [0], [0], [0, 0, 1, 0], [], []>} : vector<8x64xf32>, vector<8x64xf32>, vector<8x8xf32> -> vector<8x8xf32>
    %cst_56 = arith.constant 0xFF800000 : f32
    %77 = vector.broadcast %cst_56 : f32 to vector<8x8xf32>
    %78 = arith.select %7, %76, %77 : vector<8x8xi1>, vector<8x8xf32>
    %cst_57 = arith.constant dense<0xFF800000> : vector<8xf32>
    %79 = vector.multi_reduction <maximumf>, %78, %cst_57 [1] : vector<8x8xf32> to vector<8xf32>
    %80 = vector.shape_cast %79 : vector<8xf32> to vector<8x1xf32>
    %81 = vector.broadcast %80 : vector<8x1xf32> to vector<8x8xf32>
    %82 = arith.subf %78, %81 : vector<8x8xf32>
    %83 = math.exp %82 : vector<8x8xf32>
    %cst_58 = arith.constant dense<0.000000e+00> : vector<8xf32>
    %84 = vector.multi_reduction <add>, %83, %cst_58 [1] : vector<8x8xf32> to vector<8xf32>
    %85 = vector.shape_cast %84 : vector<8xf32> to vector<8x1xf32>
    %86 = tpu.reciprocal %85 {approx = true} : vector<8x1xf32> -> vector<8x1xf32>
    %cst_59 = arith.constant dense<0.000000e+00> : vector<8x64xf32>
    %87 = tpu.matmul %83, %75, %cst_59 {dimension_numbers = #tpu.dot_dimension_numbers<[1], [0], [0], [1], [0, 0, 1, 1], [], []>} : vector<8x8xf32>, vector<8x64xf32>, vector<8x64xf32> -> vector<8x64xf32>
    %88 = vector.broadcast %86 : vector<8x1xf32> to vector<8x64xf32>
    %89 = arith.mulf %87, %88 : vector<8x64xf32>
    %cst_60 = arith.constant dense<0.000000e+00> : vector<8x384xf32>
    %90 = tpu.matmul %89, %72, %cst_60 {dimension_numbers = #tpu.dot_dimension_numbers<[1], [0], [0], [1], [0, 0, 1, 1], [], []>} : vector<8x64xf32>, vector<64x384xf32>, vector<8x384xf32> -> vector<8x384xf32>
    %c0_61 = arith.constant 0 : index
    %c0_62 = arith.constant 0 : index
    %91 = vector.load %arg7[%c0_61, %c0_62] : memref<8x384xf32, #tpu.memory_space<vmem>>, vector<8x384xf32>
    %92 = arith.addf %91, %90 : vector<8x384xf32>
    %c0_63 = arith.constant 0 : index
    %c0_64 = arith.constant 0 : index
    %93 = vector.load %arg7[%c0_63, %c0_64] : memref<8x384xf32, #tpu.memory_space<vmem>>, vector<8x384xf32>
    tpu.vector_store %arg7[%c0_63, %c0_64], %92 {strides = array<i32>} : memref<8x384xf32, #tpu.memory_space<vmem>>, vector<8x384xf32>,
    %c256 = arith.constant 256 : index
    %c0_65 = arith.constant 0 : index
    %94 = vector.load %arg3[%c256, %c0_65] : memref<384x384xf32, #tpu.memory_space<vmem>>, vector<64x384xf32>
    %c0_66 = arith.constant 0 : index
    %c256_67 = arith.constant 256 : index
    %95 = vector.load %arg6[%c0_66, %c256_67] : memref<8x1152xf32, #tpu.memory_space<vmem>>, vector<8x64xf32>
    %c0_68 = arith.constant 0 : index
    %c640 = arith.constant 640 : index
    %96 = vector.load %arg6[%c0_68, %c640] : memref<8x1152xf32, #tpu.memory_space<vmem>>, vector<8x64xf32>
    %c0_69 = arith.constant 0 : index
    %c1024 = arith.constant 1024 : index
    %97 = vector.load %arg6[%c0_69, %c1024] : memref<8x1152xf32, #tpu.memory_space<vmem>>, vector<8x64xf32>
    %cst_70 = arith.constant dense<0.000000e+00> : vector<8x8xf32>
    %98 = tpu.matmul %95, %96, %cst_70 {dimension_numbers = #tpu.dot_dimension_numbers<[1], [1], [0], [0], [0, 0, 1, 0], [], []>} : vector<8x64xf32>, vector<8x64xf32>, vector<8x8xf32> -> vector<8x8xf32>
    %cst_71 = arith.constant 0xFF800000 : f32
    %99 = vector.broadcast %cst_71 : f32 to vector<8x8xf32>
    %100 = arith.select %7, %98, %99 : vector<8x8xi1>, vector<8x8xf32>
    %cst_72 = arith.constant dense<0xFF800000> : vector<8xf32>
    %101 = vector.multi_reduction <maximumf>, %100, %cst_72 [1] : vector<8x8xf32> to vector<8xf32>
    %102 = vector.shape_cast %101 : vector<8xf32> to vector<8x1xf32>
    %103 = vector.broadcast %102 : vector<8x1xf32> to vector<8x8xf32>
    %104 = arith.subf %100, %103 : vector<8x8xf32>
    %105 = math.exp %104 : vector<8x8xf32>
    %cst_73 = arith.constant dense<0.000000e+00> : vector<8xf32>
    %106 = vector.multi_reduction <add>, %105, %cst_73 [1] : vector<8x8xf32> to vector<8xf32>
    %107 = vector.shape_cast %106 : vector<8xf32> to vector<8x1xf32>
    %108 = tpu.reciprocal %107 {approx = true} : vector<8x1xf32> -> vector<8x1xf32>
    %cst_74 = arith.constant dense<0.000000e+00> : vector<8x64xf32>
    %109 = tpu.matmul %105, %97, %cst_74 {dimension_numbers = #tpu.dot_dimension_numbers<[1], [0], [0], [1], [0, 0, 1, 1], [], []>} : vector<8x8xf32>, vector<8x64xf32>, vector<8x64xf32> -> vector<8x64xf32>
    %110 = vector.broadcast %108 : vector<8x1xf32> to vector<8x64xf32>
    %111 = arith.mulf %109, %110 : vector<8x64xf32>
    %cst_75 = arith.constant dense<0.000000e+00> : vector<8x384xf32>
    %112 = tpu.matmul %111, %94, %cst_75 {dimension_numbers = #tpu.dot_dimension_numbers<[1], [0], [0], [1], [0, 0, 1, 1], [], []>} : vector<8x64xf32>, vector<64x384xf32>, vector<8x384xf32> -> vector<8x384xf32>
    %c0_76 = arith.constant 0 : index
    %c0_77 = arith.constant 0 : index
    %113 = vector.load %arg7[%c0_76, %c0_77] : memref<8x384xf32, #tpu.memory_space<vmem>>, vector<8x384xf32>
    %114 = arith.addf %113, %112 : vector<8x384xf32>
    %c0_78 = arith.constant 0 : index
    %c0_79 = arith.constant 0 : index
    %115 = vector.load %arg7[%c0_78, %c0_79] : memref<8x384xf32, #tpu.memory_space<vmem>>, vector<8x384xf32>
    tpu.vector_store %arg7[%c0_78, %c0_79], %114 {strides = array<i32>} : memref<8x384xf32, #tpu.memory_space<vmem>>, vector<8x384xf32>,
    %c320 = arith.constant 320 : index
    %c0_80 = arith.constant 0 : index
    %116 = vector.load %arg3[%c320, %c0_80] : memref<384x384xf32, #tpu.memory_space<vmem>>, vector<64x384xf32>
    %c0_81 = arith.constant 0 : index
    %c320_82 = arith.constant 320 : index
    %117 = vector.load %arg6[%c0_81, %c320_82] : memref<8x1152xf32, #tpu.memory_space<vmem>>, vector<8x64xf32>
    %c0_83 = arith.constant 0 : index
    %c704 = arith.constant 704 : index
    %118 = vector.load %arg6[%c0_83, %c704] : memref<8x1152xf32, #tpu.memory_space<vmem>>, vector<8x64xf32>
    %c0_84 = arith.constant 0 : index
    %c1088 = arith.constant 1088 : index
    %119 = vector.load %arg6[%c0_84, %c1088] : memref<8x1152xf32, #tpu.memory_space<vmem>>, vector<8x64xf32>
    %cst_85 = arith.constant dense<0.000000e+00> : vector<8x8xf32>
    %120 = tpu.matmul %117, %118, %cst_85 {dimension_numbers = #tpu.dot_dimension_numbers<[1], [1], [0], [0], [0, 0, 1, 0], [], []>} : vector<8x64xf32>, vector<8x64xf32>, vector<8x8xf32> -> vector<8x8xf32>
    %cst_86 = arith.constant 0xFF800000 : f32
    %121 = vector.broadcast %cst_86 : f32 to vector<8x8xf32>
    %122 = arith.select %7, %120, %121 : vector<8x8xi1>, vector<8x8xf32>
    %cst_87 = arith.constant dense<0xFF800000> : vector<8xf32>
    %123 = vector.multi_reduction <maximumf>, %122, %cst_87 [1] : vector<8x8xf32> to vector<8xf32>
    %124 = vector.shape_cast %123 : vector<8xf32> to vector<8x1xf32>
    %125 = vector.broadcast %124 : vector<8x1xf32> to vector<8x8xf32>
    %126 = arith.subf %122, %125 : vector<8x8xf32>
    %127 = math.exp %126 : vector<8x8xf32>
    %cst_88 = arith.constant dense<0.000000e+00> : vector<8xf32>
    %128 = vector.multi_reduction <add>, %127, %cst_88 [1] : vector<8x8xf32> to vector<8xf32>
    %129 = vector.shape_cast %128 : vector<8xf32> to vector<8x1xf32>
    %130 = tpu.reciprocal %129 {approx = true} : vector<8x1xf32> -> vector<8x1xf32>
    %cst_89 = arith.constant dense<0.000000e+00> : vector<8x64xf32>
    %131 = tpu.matmul %127, %119, %cst_89 {dimension_numbers = #tpu.dot_dimension_numbers<[1], [0], [0], [1], [0, 0, 1, 1], [], []>} : vector<8x8xf32>, vector<8x64xf32>, vector<8x64xf32> -> vector<8x64xf32>
    %132 = vector.broadcast %130 : vector<8x1xf32> to vector<8x64xf32>
    %133 = arith.mulf %131, %132 : vector<8x64xf32>
    %cst_90 = arith.constant dense<0.000000e+00> : vector<8x384xf32>
    %134 = tpu.matmul %133, %116, %cst_90 {dimension_numbers = #tpu.dot_dimension_numbers<[1], [0], [0], [1], [0, 0, 1, 1], [], []>} : vector<8x64xf32>, vector<64x384xf32>, vector<8x384xf32> -> vector<8x384xf32>
    %c0_91 = arith.constant 0 : index
    %c0_92 = arith.constant 0 : index
    %135 = vector.load %arg7[%c0_91, %c0_92] : memref<8x384xf32, #tpu.memory_space<vmem>>, vector<8x384xf32>
    %136 = arith.addf %135, %134 : vector<8x384xf32>
    %c0_93 = arith.constant 0 : index
    %c0_94 = arith.constant 0 : index
    %137 = vector.load %arg7[%c0_93, %c0_94] : memref<8x384xf32, #tpu.memory_space<vmem>>, vector<8x384xf32>
    tpu.vector_store %arg7[%c0_93, %c0_94], %136 {strides = array<i32>} : memref<8x384xf32, #tpu.memory_space<vmem>>, vector<8x384xf32>,
    %c0_95 = arith.constant 0 : index
    %c0_96 = arith.constant 0 : index
    %138 = vector.load %arg7[%c0_95, %c0_96] : memref<8x384xf32, #tpu.memory_space<vmem>>, vector<8x384xf32>
    %c0_97 = arith.constant 0 : index
    %c0_98 = arith.constant 0 : index
    %139 = vector.load %arg4[%c0_97, %c0_98] : memref<1x384xf32, #tpu.memory_space<vmem>>, vector<1x384xf32>
    %140 = vector.broadcast %139 : vector<1x384xf32> to vector<8x384xf32>
    %141 = arith.addf %138, %140 : vector<8x384xf32>
    %142 = vector.shape_cast %141 : vector<8x384xf32> to vector<1x8x384xf32>
    %c0_99 = arith.constant 0 : index
    %c0_100 = arith.constant 0 : index
    %c0_101 = arith.constant 0 : index
    %143 = vector.load %arg5[%c0_99, %c0_100, %c0_101] : memref<1x8x384xf32, #tpu.memory_space<vmem>>, vector<1x8x384xf32>
    tpu.vector_store %arg5[%c0_99, %c0_100, %c0_101], %142 {strides = array<i32>} : memref<1x8x384xf32, #tpu.memory_space<vmem>>, vector<1x8x384xf32>,
    return
  }
  func.func @transform_0(%arg0: i32) -> (i32, i32, i32) {
    %c0_i32 = arith.constant 0 : i32
    %c0_i32_0 = arith.constant 0 : i32
    %c0_i32_1 = arith.constant 0 : i32
    return %arg0, %c0_i32, %c0_i32_0 : i32, i32, i32
  }
  func.func @transform_1(%arg0: i32) -> (i32, i32) {
    %c0_i32 = arith.constant 0 : i32
    %c0_i32_0 = arith.constant 0 : i32
    %c0_i32_1 = arith.constant 0 : i32
    return %c0_i32, %c0_i32_0 : i32, i32
  }
  func.func @transform_2(%arg0: i32) -> (i32, i32) {
    %c0_i32 = arith.constant 0 : i32
    %c0_i32_0 = arith.constant 0 : i32
    %c0_i32_1 = arith.constant 0 : i32
    return %c0_i32, %c0_i32_0 : i32, i32
  }
  func.func @transform_3(%arg0: i32) -> (i32, i32) {
    %c0_i32 = arith.constant 0 : i32
    %c0_i32_0 = arith.constant 0 : i32
    %c0_i32_1 = arith.constant 0 : i32
    return %c0_i32, %c0_i32_0 : i32, i32
  }
  func.func @transform_4(%arg0: i32) -> (i32, i32, i32) {
    %c0_i32 = arith.constant 0 : i32
    %c0_i32_0 = arith.constant 0 : i32
    %c0_i32_1 = arith.constant 0 : i32
    return %arg0, %c0_i32, %c0_i32_0 : i32, i32, i32
  }
}

</mosaic_0001>

<bundles_post_ra>
// kernel: tpu_custom_call.1
= control target key start
LH: loop header
LB: loop body
LE: loop exit
PB: predicated region body
PF: predicated region fallthrough
CT: control target
= control target key end

     0   :  { %9 = vsyncpa [#allocation5], 0  ;;  %s4816_s0 = inlined_call_operand.hbm [shape: f32[2,8,384], index: 0, kind: input, shape index: {}]   ;;  %s4817_s1 = inlined_call_operand.hbm [shape: f32[384,1152], index: 1, kind: input, shape index: {}]   ;;  %s4818_s2 = inlined_call_operand.hbm [shape: f32[384,384], index: 2, kind: input, shape index: {}]   ;;  %s4819_s3 = inlined_call_operand.hbm [shape: f32[1,384], index: 3, kind: input, shape index: {}]   ;;  %s4820_s4 = inlined_call_operand.hbm [shape: f32[2,8,384], index: 4, kind: output, shape index: {}]  }
   0x1   :  { %11 = vsyncpa [#allocation5 + $0x1], 0 }
   0x2   :  { %12 = vsyncpa [#allocation8], 0 }
   0x3   :  { %13 = vsyncpa [#allocation11], 0 }
   0x4   :  { %14 = vsyncpa [#allocation6], 0 }
   0x5   :  { %16 = vsyncpa [#allocation6 + $0x1], 0  ;;  %s4334_s15 = smov 0   ;;  %s4336_s16 = smov 0  }
   0x6   :  { %s4338_s17 = smov 0   ;;  %s4340_s18 = smov 0  }
   0x7 LB: > { %s4355_s19 = sadd.s32 4294967295, %s4295_s18   ;;  %s3619_s20 = sadd.s32 4294967294, %s4295_s18   ;;  %s4295_s18 = sphi %s4340_s18, %s4846_s18   ;;  %s4291_s17 = sphi %s4338_s17, %s4845_s17   ;;  %s4287_s16 = sphi %s4336_s16, %s4844_s16   ;;  %s4283_s15 = sphi %s4334_s15, %s4843_s15  }
   0x8   : > { %p42_p0 = scmp.ne.s32.totalorder %s4287_s16, %s4283_s15  ;;  %p4821_p1 = scmp.eq.s32.totalorder %s4355_s19, 0 }
   0x9   : > { %p135_p3 = scmp.eq.s32.totalorder %s3619_s20, 1  ;;  %p3620_p5 = scmp.ge.s32.totalorder %s4295_s18, 1 }
   0xa   : > { %p4364_p4 = por %p4821_p1, %p42_p0  ;;  %p142_p7 = scmp.lt.s32.totalorder %s4295_s18, 3 }
   0xb   : > { %p4369_p6 = por %p135_p3, %p42_p0  ;;  %s4297_s24 = smov [#allocation7]  }
   0xc   : > { %s4825_s21 = scalar_select %p4364_p4, 1, 0 }
   0xd   : > { %s4826_s22 = scalar_select %p4369_p6, 1, 0 }
   0xe   : > { %p4374_p8 = pnand %p3620_p5, %p142_p7  ;;  %s154_s25 = sshll.u32 %s4297_s24, 4  ;;  %s155_s25 = int_to_ptr.vmem [resolvable:$true] %s154_s25 }
   0xf   : > { %s4298_s27 = smov [#allocation9]   ;;  %s4128_s29 = scalar_lea.vmem %s155_s25, 55296 }
  0x10   : > { %s4827_s23 = scalar_select %p4374_p8, 1, 0 }
  0x11   : > { %p4022_p9 = pneg %p4374_p8  ;;  %s167_s28 = sshll.u32 %s4298_s27, 4  ;;  %s168_s28 = int_to_ptr.vmem [resolvable:$true] %s167_s28 }
  0x12   : > { %p4129_p13 = scmp.ne.s32.totalorder %s155_s25, %s4128_s29  ;;  %p4136_p5 = scmp.lt.s32.totalorder %s155_s25, %s155_s25 }
  0x13   : > { %p4383_p11 = pnand %p4022_p9, %p4821_p1  ;;  %p4137_p7 = scmp.lt.s32.totalorder %s4128_s29, %s4128_s29 }
  0x15   : > { %p4119_p12 = pneg %p4383_p11  ;;  %p4138_p10 = por %p4137_p7, %p4136_p5 }
  0x17   : > { %p4131_p0 = pnand %p4129_p13, %p4119_p12 }
  0x19   : > { %p4132_p3 = pneg %p4131_p0 }
  0x1b   : > { %p4139_p9 = pnand %p4138_p10, %p4132_p3 }
  0x1d   : > { %4142 = shalt.err (!%p4139_p9)
}
  0x1e   : > { %s4299_s30 = smov 1152   ;;  %s4300_s5 = smov 72  }
  0x1f   : > { %4025 = dma.hbm_to_vmem [thread:$0]  (!%p4383_p11), %s4817_s1, 55296, %s155_s25, [#allocation8], %s4299_s30, %s4299_s30, %s4300_s5  }
  0x20   : > { %s4154_s8 = scalar_lea.vmem %s168_s28, 18432  ;;  %p4162_p2 = scmp.lt.s32.totalorder %s168_s28, %s168_s28 }
  0x21   : > { %p4155_p1 = scmp.ne.s32.totalorder %s168_s28, %s4154_s8  ;;  %p4163_p6 = scmp.lt.s32.totalorder %s4154_s8, %s4154_s8 }
  0x23   : > { %p4157_p13 = pnand %p4155_p1, %p4119_p12  ;;  %p4164_p5 = por %p4163_p6, %p4162_p2 }
  0x25   : > { %p4158_p0 = pneg %p4157_p13 }
  0x27   : > { %p4165_p10 = pnand %p4164_p5, %p4158_p0 }
  0x29   : > { %4168 = shalt.err (!%p4165_p10)
}
  0x2a   : > { %s4301_s9 = smov 384   ;;  %s4302_s10 = smov 24  }
  0x2b   : > { %4028 = dma.hbm_to_vmem [thread:$0]  (!%p4383_p11), %s4818_s2, 18432, %s168_s28, [#allocation8], %s4301_s9, %s4301_s9, %s4302_s10  }
  0x2c   : > { %s4303_s13 = smov [#allocation10]   ;;  %s4406_s20 = sadd.s32 1, %s4295_s18  }
  0x2d   : > { %s181_s14 = sshll.u32 %s4303_s13, 4  ;;  %s182_s14 = int_to_ptr.vmem [resolvable:$true] %s181_s14 }
  0x2e   : > { %s4180_s24 = scalar_lea.vmem %s182_s14, 48  ;;  %s4187_s25 = scalar_lea.vmem %s182_s14, 64 }
  0x2f   : > { %p4181_p1 = scmp.ne.s32.totalorder %s182_s14, %s4180_s24  ;;  %p4188_p3 = scmp.lt.s32.totalorder %s182_s14, %s182_s14 }
  0x30   : > { %p4189_p7 = scmp.lt.s32.totalorder %s4187_s25, %s4180_s24 }
  0x31   : > { %p4183_p2 = pnand %p4181_p1, %p4119_p12 }
  0x32   : > { %p4190_p9 = por %p4189_p7, %p4188_p3 }
  0x33   : > { %p4184_p6 = pneg %p4183_p2 }
  0x35   : > { %p4191_p13 = pnand %p4190_p9, %p4184_p6 }
  0x37   : > { %4194 = shalt.err (!%p4191_p13)
}
  0x38   : > { %4031 = dma.hbm_to_vmem [thread:$0]  (!%p4383_p11), %s4819_s3, 48, %s182_s14, [#allocation11]  }
  0x39   : > { %s26_s29 = ssub.s32 %s4295_s18, %s4406_s20  ;;  %s29_s30 = sadd.s32 1, %s4291_s17 }
  0x3a   : > { %p27_p12 = scmp.eq.s32.totalorder %s26_s29, 0  ;;  %p36_p0 = scmp.ne.s32.totalorder %s4291_s17, %s4287_s16 }
  0x3b   : > { %p37_p5 = scmp.eq.s32.totalorder %s4295_s18, 0  ;;  %p4043_p10 = scmp.lt.s32.totalorder %s4295_s18, 2 }
  0x3c   : > { %s4424_s26 = scalar_select %p27_p12, %s4291_s17, %s29_s30  }
  0x3d   : > { %p38_p1 = por %p37_p5, %p36_p0  ;;  %p4829_p2 = scmp.eq.s32.totalorder %s4355_s19, 1 }
  0x3e   : > { %s192_s6 = sand.u32 1, %s4291_s17   ;;  %s4003_s7 = smul.u32 384, %s4295_s18 }
  0x3f   : > { %p4428_p6 = por %p4829_p2, %p36_p0  ;;  %s4002_s8 = smul.u32 24, %s192_s6 }
  0x40   : > { %p4434_p3 = pnand %p4043_p10, %p38_p1  ;;  %s4441_s12 = scalar_lea.hbm %s4816_s0, %s4003_s7 }
  0x41   : > { %s4830_s5 = scalar_select %p4428_p6, 1, 0 }
  0x42   : > { %s196_s13 = scalar_lea.vmem [#allocation4], %s4002_s8  ;;  %s193_s24 = scalar_lea.sflag [#allocation5], %s192_s6 }
  0x43   : > { %s204_s14 = sshll.u32 %s196_s13, 4  ;;  %s4195_s25 = scalar_lea.hbm %s4441_s12, 384  ;;  %s205_s14 = int_to_ptr.vmem [resolvable:$true] %s204_s14 }
  0x44   : > { %p4196_p11 = scmp.ne.s32.totalorder %s4441_s12, %s4195_s25  ;;  %p4197_p7 = pneg %p4434_p3 }
  0x45   : > { %s4200_s29 = scalar_lea.hbm %s4816_s0, 768  ;;  %p4201_p12 = scmp.lt.s32.totalorder %s4441_s12, %s4816_s0 }
  0x46   : > { %p4198_p9 = pnand %p4197_p7, %p4196_p11  ;;  %p4202_p0 = scmp.lt.s32.totalorder %s4200_s29, %s4195_s25 }
  0x48   : > { %p4199_p13 = pneg %p4198_p9  ;;  %p4203_p5 = por %p4202_p0, %p4201_p12 }
  0x4a   : > { %p4204_p10 = pnand %p4203_p5, %p4199_p13 }
  0x4c   : > { %4207 = shalt.err (!%p4204_p10)
}
  0x4d   : > { %s4208_s8 = scalar_lea.vmem %s205_s14, 384  ;;  %s4304_s6 = smov [#allocation4]  }
  0x4e   : > { %p4209_p1 = scmp.ne.s32.totalorder %s205_s14, %s4208_s8  ;;  %s4213_s10 = sshll.u32 %s4304_s6, 4  ;;  %s4214_s10 = int_to_ptr.vmem [resolvable:$false] %s4213_s10 }
  0x4f   : > { %s4215_s11 = scalar_lea.vmem %s4214_s10, 768  ;;  %p4216_p11 = scmp.lt.s32.totalorder %s205_s14, %s4214_s10 }
  0x50   : > { %p4211_p2 = pnand %p4209_p1, %p4197_p7  ;;  %p4217_p9 = scmp.lt.s32.totalorder %s4215_s11, %s4208_s8 }
  0x52   : > { %p4212_p6 = pneg %p4211_p2  ;;  %p4218_p4 = por %p4217_p9, %p4216_p11 }
  0x54   : > { %p4219_p8 = pnand %p4218_p4, %p4212_p6 }
  0x56   : > { %4222 = shalt.err (!%p4219_p8)
}
  0x57   : > { %4035 = dma.hbm_to_vmem [thread:$0]  (!%p4434_p3), %s4441_s12, 384, %s205_s14, %s193_s24  }
  0x58   : > { %p4832_p13 = scmp.ne.s32.totalorder %s4827_s23, 0 }
  0x59   : > { %s4460_s13 = sand.u32 (!%p4832_p13), 1, %s4287_s16   ;;  %p4833_p4 = scmp.ne.s32.totalorder (!%p4832_p13), %s4825_s21, 0 }
  0x5a   : > { %213 = sbr.rel (%p4832_p13) target bundleno = 3911 (0xf47), region = 36  ;;  %s216_s27 = scalar_lea.sflag (!%p4832_p13), [#allocation5], %s4460_s13 }
  0x5b   : > { %s4004_s25 = smul.u32 (!%p4832_p13), 24, %s4460_s13 }
  0x5d   : > { %s4466_s28 = scalar_lea.vmem (!%p4832_p13), [#allocation4], %s4004_s25 }
  0x5f   : > { %4266 = dma.done.wait (%p4833_p4), %s216_s27, 384  }
  0x60   : > { %4268 = vsyncadd (%p4833_p4), %s216_s27, 4294966912  ;;  %p4834_p8 = scmp.eq.s32.totalorder %s4355_s19, 0 }
  0x62   : > { %4270 = dma.done.wait (%p4834_p8), [#allocation8], 73728   ;;  %p4835_p6 = pmov %p4834_p8 }
  0x64   : > { %4272 = vsyncadd (%p4835_p6), [#allocation8], 4294893568  ;;  %p4836_p3 = pmov %p4835_p6 }
  0x66   : > { %4274 = dma.done.wait (%p4836_p3), [#allocation11], 48   ;;  %p4837_p7 = pmov %p4836_p3 }
  0x67   : > { %v4305_v0 = vmov 0.0   ;;  %v395_v1 = vld [vmem:[#allocation7 + $0x440] sm:$0xff]  ;;  %v394_v3 = vld [vmem:[#allocation7 + $0x438] sm:$0xff]  ;;  %v385_v7 = vld [vmem:[#allocation7 + $0x3f0] sm:$0xff]  ;;  %vm4306_vm0 = vmmov 0   ;;  %vm1440_vm1 = vcmask 523264  }
  0x68   : > { %4276 = vsyncadd (%p4837_p7), [#allocation11], 4294967248  ;;  %826 = vmatprep.mubr.f32.mxu1 %v4305_v0  ;;  %v683_v2 = vld [vmem:[#allocation7 + $0xd40] sm:$0xff]  ;;  %691 = vmatprep.subr.mxu0 %v395_v1  ;;  %v682_v4 = vld [vmem:[#allocation7 + $0xd38] sm:$0xff]  ;;  %s4307_s21 = smov 64   ;;  %vm1518_vm3 = vcmask 64512  }
  0x69   : > { %762 = vmatprep.subr.mxu1 %v683_v2  ;;  %v386_v5 = vld [vmem:[#allocation7 + $0x3f8] sm:$0xff]  ;;  %692 = vmatpush1.msra.mxu0 %v394_v3  ;;  %v673_v8 = vld [vmem:[#allocation7 + $0xcf0] sm:$0xff]  ;;  %v376_v11 = vld [vmem:[#allocation7 + $0x3a8] sm:$0xff]  ;;  %s4005_s23 = smul.u32 384, %s4355_s19  ;;  %s255_s9 = scalar_lea.vmem [#allocation12], %s4004_s25 }
  0x6a   : > { %v674_v6 = vld [vmem:[#allocation7 + $0xcf8] sm:$0xff]  ;;  %763 = vmatpush1.msra.mxu1 %v682_v4  ;;  %v377_v9 = vld [vmem:[#allocation7 + $0x3b0] sm:$0xff]  ;;  %693 = vmatprep.subr.mxu0 %v386_v5  ;;  %v664_v12 = vld [vmem:[#allocation7 + $0xca8] sm:$0xff]  ;;  %s3520_s12 = sshll.u32 %s255_s9, 4  ;;  %s3506_s19 = scalar_lea.sflag [#allocation6], %s4460_s13  ;;  %s3521_s12 = int_to_ptr.vmem [resolvable:$true] %s3520_s12 }
  0x6b   : > { %764 = vmatprep.subr.mxu1 %v674_v6  ;;  %v665_v10 = vld [vmem:[#allocation7 + $0xcb0] sm:$0xff]  ;;  %694 = vmatpush1.msra.mxu0 %v385_v7  ;;  %v368_v13 = vld [vmem:[#allocation7 + $0x368] sm:$0xff]  ;;  %v367_v15 = vld [vmem:[#allocation7 + $0x360] sm:$0xff]  ;;  %s3518_s29 = scalar_lea.hbm %s4820_s4, %s4005_s23  ;;  %s4223_s30 = scalar_lea.vmem %s3521_s12, 384 }
  0x6c   : > { %765 = vmatpush1.msra.mxu1 %v673_v8  ;;  %v656_v14 = vld [vmem:[#allocation7 + $0xc68] sm:$0xff]  ;;  %695 = vmatprep.subr.mxu0 %v377_v9  ;;  %v655_v16 = vld [vmem:[#allocation7 + $0xc60] sm:$0xff]  ;;  %v358_v19 = vld [vmem:[#allocation7 + $0x318] sm:$0xff]  ;;  %p4224_p12 = scmp.ne.s32.totalorder %s3521_s12, %s4223_s30  ;;  %p4840_p0 = scmp.ne.s32.totalorder %s4830_s5, 0 }
  0x6d   : > { %766 = vmatprep.subr.mxu1 %v665_v10  ;;  %696 = vmatpush1.msra.mxu0 %v376_v11  ;;  %v359_v17 = vld [vmem:[#allocation7 + $0x320] sm:$0xff]  ;;  %v646_v20 = vld [vmem:[#allocation7 + $0xc18] sm:$0xff]  ;;  %v349_v23 = vld [vmem:[#allocation7 + $0x2d0] sm:$0xff]  ;;  %s4308_s7 = smov [#allocation12]  }
  0x6e   : > { %767 = vmatpush1.msra.mxu1 %v664_v12  ;;  %v647_v18 = vld [vmem:[#allocation7 + $0xc20] sm:$0xff]  ;;  %697 = vmatprep.subr.mxu0 %v368_v13  ;;  %v350_v21 = vld [vmem:[#allocation7 + $0x2d8] sm:$0xff]  ;;  %v637_v24 = vld [vmem:[#allocation7 + $0xbd0] sm:$0xff]  ;;  %p4225_p5 = pnand %p4224_p12, %p4840_p0  ;;  %s4227_s8 = sshll.u32 %s4308_s7, 4  ;;  %s4228_s8 = int_to_ptr.vmem [resolvable:$false] %s4227_s8 }
  0x6f   : > { %768 = vmatprep.subr.mxu1 %v656_v14  ;;  %698 = vmatpush1.msra.mxu0 %v367_v15  ;;  %v638_v22 = vld [vmem:[#allocation7 + $0xbd8] sm:$0xff]  ;;  %v341_v25 = vld [vmem:[#allocation7 + $0x290] sm:$0xff]  ;;  %v340_v27 = vld [vmem:[#allocation7 + $0x288] sm:$0xff]  ;;  %s4229_s6 = scalar_lea.vmem %s4228_s8, 768  ;;  %p4230_p1 = scmp.lt.s32.totalorder %s3521_s12, %s4228_s8 }
  0x70   : > { %769 = vmatpush1.msra.mxu1 %v655_v16  ;;  %699 = vmatprep.subr.mxu0 %v359_v17  ;;  %v629_v26 = vld [vmem:[#allocation7 + $0xb90] sm:$0xff]  ;;  %v628_v28 = vld [vmem:[#allocation7 + $0xb88] sm:$0xff]  ;;  %v331_v31 = vld [vmem:[#allocation7 + $0x240] sm:$0xff]  ;;  %p4226_p10 = pneg %p4225_p5  ;;  %p4231_p2 = scmp.lt.s32.totalorder %s4229_s6, %s4223_s30 }
  0x71   : > { %770 = vmatprep.subr.mxu1 %v647_v18  ;;  %700 = vmatpush1.msra.mxu0 %v358_v19  ;;  %v332_v29 = vld [vmem:[#allocation7 + $0x248] sm:$0xff]  ;;  %v619_v32 = vld [vmem:[#allocation7 + $0xb40] sm:$0xff]  ;;  %v322_v35 = vld [vmem:[#allocation7 + $0x1f8] sm:$0xff] }
  0x72   : > { %771 = vmatpush1.msra.mxu1 %v646_v20  ;;  %701 = vmatprep.subr.mxu0 %v350_v21  ;;  %v620_v30 = vld [vmem:[#allocation7 + $0xb48] sm:$0xff]  ;;  %v323_v33 = vld [vmem:[#allocation7 + $0x200] sm:$0xff]  ;;  %v610_v36 = vld [vmem:[#allocation7 + $0xaf8] sm:$0xff]  ;;  %p4232_p11 = por %p4231_p2, %p4230_p1 }
  0x73   : > { %772 = vmatprep.subr.mxu1 %v638_v22  ;;  %702 = vmatpush1.msra.mxu0 %v349_v23  ;;  %v611_v34 = vld [vmem:[#allocation7 + $0xb00] sm:$0xff]  ;;  %v314_v37 = vld [vmem:[#allocation7 + $0x1b8] sm:$0xff]  ;;  %v313_v39 = vld [vmem:[#allocation7 + $0x1b0] sm:$0xff] }
  0x74   : > { %773 = vmatpush1.msra.mxu1 %v637_v24  ;;  %703 = vmatprep.subr.mxu0 %v341_v25  ;;  %v602_v38 = vld [vmem:[#allocation7 + $0xab8] sm:$0xff]  ;;  %v601_v40 = vld [vmem:[#allocation7 + $0xab0] sm:$0xff]  ;;  %v304_v43 = vld [vmem:[#allocation7 + $0x168] sm:$0xff]  ;;  %p4233_p9 = pnand %p4232_p11, %p4226_p10 }
  0x75   : > { %774 = vmatprep.subr.mxu1 %v629_v26  ;;  %704 = vmatpush1.msra.mxu0 %v340_v27  ;;  %v305_v41 = vld [vmem:[#allocation7 + $0x170] sm:$0xff]  ;;  %v592_v44 = vld [vmem:[#allocation7 + $0xa68] sm:$0xff]  ;;  %v295_v47 = vld [vmem:[#allocation7 + $0x120] sm:$0xff] }
  0x76   : > { %775 = vmatpush1.msra.mxu1 %v628_v28  ;;  %705 = vmatprep.subr.mxu0 %v332_v29  ;;  %v593_v42 = vld [vmem:[#allocation7 + $0xa70] sm:$0xff]  ;;  %v296_v45 = vld [vmem:[#allocation7 + $0x128] sm:$0xff]  ;;  %v583_v48 = vld [vmem:[#allocation7 + $0xa20] sm:$0xff] }
  0x77   : > { %776 = vmatprep.subr.mxu1 %v620_v30  ;;  %706 = vmatpush1.msra.mxu0 %v331_v31  ;;  %v584_v46 = vld [vmem:[#allocation7 + $0xa28] sm:$0xff]  ;;  %v287_v49 = vld [vmem:[#allocation7 + $0xe0] sm:$0xff]  ;;  %v286_v51 = vld [vmem:[#allocation7 + $0xd8] sm:$0xff] }
  0x78   : > { %777 = vmatpush1.msra.mxu1 %v619_v32  ;;  %707 = vmatprep.subr.mxu0 %v323_v33  ;;  %v575_v50 = vld [vmem:[#allocation7 + $0x9e0] sm:$0xff]  ;;  %v574_v52 = vld [vmem:[#allocation7 + $0x9d8] sm:$0xff]  ;;  %v277_v55 = vld [vmem:[#allocation7 + $0x90] sm:$0xff] }
  0x79   : > { %778 = vmatprep.subr.mxu1 %v611_v34  ;;  %708 = vmatpush1.msra.mxu0 %v322_v35  ;;  %v278_v53 = vld [vmem:[#allocation7 + $0x98] sm:$0xff]  ;;  %v565_v56 = vld [vmem:[#allocation7 + $0x990] sm:$0xff]  ;;  %v268_v59 = vld [vmem:[#allocation7 + $0x48] sm:$0xff] }
  0x7a   : > { %779 = vmatpush1.msra.mxu1 %v610_v36  ;;  %709 = vmatprep.subr.mxu0 %v314_v37  ;;  %v566_v54 = vld [vmem:[#allocation7 + $0x998] sm:$0xff]  ;;  %v269_v57 = vld [vmem:[#allocation7 + $0x50] sm:$0xff]  ;;  %v556_v60 = vld [vmem:[#allocation7 + $0x948] sm:$0xff] }
  0x7b   : > { %780 = vmatprep.subr.mxu1 %v602_v38  ;;  %710 = vmatpush1.msra.mxu0 %v313_v39  ;;  %v557_v58 = vld [vmem:[#allocation7 + $0x950] sm:$0xff]  ;;  %v260_v61 = vld [vmem:[#allocation7 + $0x8] sm:$0xff]  ;;  %v259_v63 = vld [vmem:[#allocation7] sm:$0xff] }
  0x7c   : > { %781 = vmatpush1.msra.mxu1 %v601_v40  ;;  %711 = vmatprep.subr.mxu0 %v305_v41  ;;  %v548_v62 = vld [vmem:[#allocation7 + $0x908] sm:$0xff]  ;;  %v547_v1 = vld [vmem:[#allocation7 + $0x900] sm:$0xff]  ;;  %v397_v4 = vld [vmem:[#allocation7 + $0x450] sm:$0xff] }
  0x7d   : > { %782 = vmatprep.subr.mxu1 %v593_v42  ;;  %712 = vmatpush1.msra.mxu0 %v304_v43  ;;  %v539_v2 = vld [vmem:[#allocation7 + $0x8c0] sm:$0xff]  ;;  %v538_v5 = vld [vmem:[#allocation7 + $0x8b8] sm:$0xff]  ;;  %v396_v6 = vld [vmem:[#allocation7 + $0x448] sm:$0xff] }
  0x7e   : > { %783 = vmatpush1.msra.mxu1 %v592_v44  ;;  %713 = vmatprep.subr.mxu0 %v296_v45  ;;  %v4482_v3 = vld [vmem:[%s4466_s28 + $0x10] sm:$0xff]  ;;  %v388_v8 = vld [vmem:[#allocation7 + $0x408] sm:$0xff]  ;;  %v529_v9 = vld [vmem:[#allocation7 + $0x870] sm:$0xff] }
  0x7f   : > { %784 = vmatprep.subr.mxu1 %v584_v46  ;;  %714 = vmatpush1.msra.mxu0 %v295_v47  ;;  %v530_v7 = vld [vmem:[#allocation7 + $0x878] sm:$0xff]  ;;  %v387_v10 = vld [vmem:[#allocation7 + $0x400] sm:$0xff]  ;;  %v521_v11 = vld [vmem:[#allocation7 + $0x830] sm:$0xff] }
  0x80   : > { %785 = vmatpush1.msra.mxu1 %v583_v48  ;;  %715 = vmatprep.subr.mxu0 %v287_v49  ;;  %v379_v12 = vld [vmem:[#allocation7 + $0x3c0] sm:$0xff]  ;;  %v520_v13 = vld [vmem:[#allocation7 + $0x828] sm:$0xff]  ;;  %v378_v14 = vld [vmem:[#allocation7 + $0x3b8] sm:$0xff] }
  0x81   : > { %786 = vmatprep.subr.mxu1 %v575_v50  ;;  %716 = vmatpush1.msra.mxu0 %v286_v51  ;;  %v512_v15 = vld [vmem:[#allocation7 + $0x7e8] sm:$0xff]  ;;  %v370_v16 = vld [vmem:[#allocation7 + $0x378] sm:$0xff]  ;;  %v511_v17 = vld [vmem:[#allocation7 + $0x7e0] sm:$0xff] }
  0x82   : > { %787 = vmatpush1.msra.mxu1 %v574_v52  ;;  %717 = vmatprep.subr.mxu0 %v278_v53  ;;  %v369_v18 = vld [vmem:[#allocation7 + $0x370] sm:$0xff]  ;;  %v503_v19 = vld [vmem:[#allocation7 + $0x7a0] sm:$0xff]  ;;  %v502_v21 = vld [vmem:[#allocation7 + $0x798] sm:$0xff] }
  0x83   : > { %788 = vmatprep.subr.mxu1 %v566_v54  ;;  %718 = vmatpush1.msra.mxu0 %v277_v55  ;;  %v361_v20 = vld [vmem:[#allocation7 + $0x330] sm:$0xff]  ;;  %v360_v22 = vld [vmem:[#allocation7 + $0x328] sm:$0xff]  ;;  %v494_v23 = vld [vmem:[#allocation7 + $0x758] sm:$0xff] }
  0x84   : > { %789 = vmatpush1.msra.mxu1 %v565_v56  ;;  %719 = vmatprep.subr.mxu0 %v269_v57  ;;  %v352_v24 = vld [vmem:[#allocation7 + $0x2e8] sm:$0xff]  ;;  %v493_v25 = vld [vmem:[#allocation7 + $0x750] sm:$0xff]  ;;  %v351_v26 = vld [vmem:[#allocation7 + $0x2e0] sm:$0xff] }
  0x85   : > { %790 = vmatprep.subr.mxu1 %v557_v58  ;;  %720 = vmatpush1.msra.mxu0 %v268_v59  ;;  %v485_v27 = vld [vmem:[#allocation7 + $0x710] sm:$0xff]  ;;  %v343_v28 = vld [vmem:[#allocation7 + $0x2a0] sm:$0xff]  ;;  %v484_v29 = vld [vmem:[#allocation7 + $0x708] sm:$0xff] }
  0x86   : > { %791 = vmatpush1.msra.mxu1 %v556_v60  ;;  %721 = vmatprep.subr.mxu0 %v260_v61  ;;  %v342_v30 = vld [vmem:[#allocation7 + $0x298] sm:$0xff]  ;;  %v476_v31 = vld [vmem:[#allocation7 + $0x6c8] sm:$0xff]  ;;  %v475_v33 = vld [vmem:[#allocation7 + $0x6c0] sm:$0xff] }
  0x87   : > { %792 = vmatprep.subr.mxu1 %v548_v62  ;;  %722 = vmatpush1.msra.mxu0 %v259_v63  ;;  %v334_v32 = vld [vmem:[#allocation7 + $0x258] sm:$0xff]  ;;  %v333_v34 = vld [vmem:[#allocation7 + $0x250] sm:$0xff]  ;;  %v467_v35 = vld [vmem:[#allocation7 + $0x680] sm:$0xff] }
  0x88   : > { %793 = vmatpush1.msra.mxu1 %v547_v1  ;;  %723 = vmatprep.subr.mxu0 %v539_v2  ;;  %v325_v36 = vld [vmem:[#allocation7 + $0x210] sm:$0xff]  ;;  %v466_v37 = vld [vmem:[#allocation7 + $0x678] sm:$0xff]  ;;  %v324_v38 = vld [vmem:[#allocation7 + $0x208] sm:$0xff] }
  0x89   : > { %827 = vmatmul.mubr.f32.vlgmr.msra.gmra.mxu1 %v4482_v3  ;;  %833 = vmatprep.subr.mxu1 %v397_v4  ;;  %v458_v39 = vld [vmem:[#allocation7 + $0x638] sm:$0xff]  ;;  %v316_v40 = vld [vmem:[#allocation7 + $0x1c8] sm:$0xff]  ;;  %v457_v41 = vld [vmem:[#allocation7 + $0x630] sm:$0xff] }
  0x8a   : > { %724 = vmatpush2.msra.mxu0 %v538_v5  ;;  %834 = vmatpush1.msra.mxu1 %v396_v6  ;;  %v315_v42 = vld [vmem:[#allocation7 + $0x1c0] sm:$0xff]  ;;  %v449_v43 = vld [vmem:[#allocation7 + $0x5f0] sm:$0xff]  ;;  %v448_v45 = vld [vmem:[#allocation7 + $0x5e8] sm:$0xff] }
  0x8b   : > { %725 = vmatprep.subr.mxu0 %v530_v7  ;;  %835 = vmatprep.subr.mxu1 %v388_v8  ;;  %v307_v44 = vld [vmem:[#allocation7 + $0x180] sm:$0xff]  ;;  %v306_v46 = vld [vmem:[#allocation7 + $0x178] sm:$0xff]  ;;  %v440_v47 = vld [vmem:[#allocation7 + $0x5a8] sm:$0xff] }
  0x8c   : > { %726 = vmatpush2.msra.mxu0 %v529_v9  ;;  %836 = vmatpush1.msra.mxu1 %v387_v10  ;;  %v298_v48 = vld [vmem:[#allocation7 + $0x138] sm:$0xff]  ;;  %v439_v49 = vld [vmem:[#allocation7 + $0x5a0] sm:$0xff]  ;;  %v297_v50 = vld [vmem:[#allocation7 + $0x130] sm:$0xff] }
  0x8d   : > { %727 = vmatprep.subr.mxu0 %v521_v11  ;;  %837 = vmatprep.subr.mxu1 %v379_v12  ;;  %v431_v51 = vld [vmem:[#allocation7 + $0x560] sm:$0xff]  ;;  %v289_v52 = vld [vmem:[#allocation7 + $0xf0] sm:$0xff]  ;;  %v430_v53 = vld [vmem:[#allocation7 + $0x558] sm:$0xff] }
  0x8e   : > { %728 = vmatpush2.msra.mxu0 %v520_v13  ;;  %838 = vmatpush1.msra.mxu1 %v378_v14  ;;  %v288_v54 = vld [vmem:[#allocation7 + $0xe8] sm:$0xff]  ;;  %v422_v55 = vld [vmem:[#allocation7 + $0x518] sm:$0xff]  ;;  %v421_v57 = vld [vmem:[#allocation7 + $0x510] sm:$0xff] }
  0x8f   : > { %729 = vmatprep.subr.mxu0 %v512_v15  ;;  %839 = vmatprep.subr.mxu1 %v370_v16  ;;  %v280_v56 = vld [vmem:[#allocation7 + $0xa8] sm:$0xff]  ;;  %v279_v58 = vld [vmem:[#allocation7 + $0xa0] sm:$0xff]  ;;  %v413_v59 = vld [vmem:[#allocation7 + $0x4d0] sm:$0xff] }
  0x90   : > { %730 = vmatpush2.msra.mxu0 %v511_v17  ;;  %840 = vmatpush1.msra.mxu1 %v369_v18  ;;  %v271_v60 = vld [vmem:[#allocation7 + $0x60] sm:$0xff]  ;;  %v412_v61 = vld [vmem:[#allocation7 + $0x4c8] sm:$0xff]  ;;  %v270_v62 = vld [vmem:[#allocation7 + $0x58] sm:$0xff] }
  0x91   : > { %731 = vmatprep.subr.mxu0 %v503_v19  ;;  %841 = vmatprep.subr.mxu1 %v361_v20  ;;  %v404_v63 = vld [vmem:[#allocation7 + $0x488] sm:$0xff]  ;;  %v262_v1 = vld [vmem:[#allocation7 + $0x18] sm:$0xff]  ;;  %v403_v2 = vld [vmem:[#allocation7 + $0x480] sm:$0xff] }
  0x92   : > { %732 = vmatpush2.msra.mxu0 %v502_v21  ;;  %842 = vmatpush1.msra.mxu1 %v360_v22  ;;  %v4486_v4 = vld [vmem:[%s4466_s28 + $0x8] sm:$0xff]  ;;  %v4489_v6 = vld [vmem:[%s4466_s28] sm:$0xff]  ;;  %v531_v13 = vld [vmem:[#allocation7 + $0x880] sm:$0xff] }
  0x93   : > { %733 = vmatprep.subr.mxu0 %v494_v23  ;;  %843 = vmatprep.subr.mxu1 %v352_v24  ;;  %v261_v5 = vld [vmem:[#allocation7 + $0x10] sm:$0xff]  ;;  %v540_v9 = vld [vmem:[#allocation7 + $0x8c8] sm:$0xff]  ;;  %v675_v14 = vld [vmem:[#allocation7 + $0xd00] sm:$0xff] }
  0x94   : > { %734 = vmatpush2.msra.mxu0 %v493_v25  ;;  %844 = vmatpush1.msra.mxu1 %v351_v26  ;;  %v541_v7 = vld [vmem:[#allocation7 + $0x8d0] sm:$0xff]  ;;  %v684_v10 = vld [vmem:[#allocation7 + $0xd48] sm:$0xff]  ;;  %v523_v15 = vld [vmem:[#allocation7 + $0x840] sm:$0xff] }
  0x95   : > { %735 = vmatprep.subr.mxu0 %v485_v27  ;;  %845 = vmatprep.subr.mxu1 %v343_v28  ;;  %v685_v8 = vld [vmem:[#allocation7 + $0xd50] sm:$0xff]  ;;  %v532_v11 = vld [vmem:[#allocation7 + $0x888] sm:$0xff]  ;;  %v667_v16 = vld [vmem:[#allocation7 + $0xcc0] sm:$0xff] }
  0x96   : > { %736 = vmatpush2.msra.mxu0 %v484_v29  ;;  %846 = vmatpush1.msra.mxu1 %v342_v30  ;;  %v676_v12 = vld [vmem:[#allocation7 + $0xd08] sm:$0xff]  ;;  %v522_v17 = vld [vmem:[#allocation7 + $0x838] sm:$0xff]  ;;  %v513_v21 = vld [vmem:[#allocation7 + $0x7f0] sm:$0xff] }
  0x97   : > { %737 = vmatprep.subr.mxu0 %v476_v31  ;;  %847 = vmatprep.subr.mxu1 %v334_v32  ;;  %v666_v18 = vld [vmem:[#allocation7 + $0xcb8] sm:$0xff]  ;;  %v657_v22 = vld [vmem:[#allocation7 + $0xc70] sm:$0xff]  ;;  %v504_v25 = vld [vmem:[#allocation7 + $0x7a8] sm:$0xff] }
  0x98   : > { %738 = vmatpush2.msra.mxu0 %v475_v33  ;;  %848 = vmatpush1.msra.mxu1 %v333_v34  ;;  %v514_v19 = vld [vmem:[#allocation7 + $0x7f8] sm:$0xff]  ;;  %v505_v23 = vld [vmem:[#allocation7 + $0x7b0] sm:$0xff]  ;;  %v648_v26 = vld [vmem:[#allocation7 + $0xc28] sm:$0xff] }
  0x99   : > { %739 = vmatprep.subr.mxu0 %v467_v35  ;;  %849 = vmatprep.subr.mxu1 %v325_v36  ;;  %v658_v20 = vld [vmem:[#allocation7 + $0xc78] sm:$0xff]  ;;  %v649_v24 = vld [vmem:[#allocation7 + $0xc30] sm:$0xff]  ;;  %v496_v27 = vld [vmem:[#allocation7 + $0x768] sm:$0xff] }
  0x9a   : > { %740 = vmatpush2.msra.mxu0 %v466_v37  ;;  %850 = vmatpush1.msra.mxu1 %v324_v38  ;;  %v640_v28 = vld [vmem:[#allocation7 + $0xbe8] sm:$0xff]  ;;  %v495_v29 = vld [vmem:[#allocation7 + $0x760] sm:$0xff]  ;;  %v486_v33 = vld [vmem:[#allocation7 + $0x718] sm:$0xff] }
  0x9b   : > { %741 = vmatprep.subr.mxu0 %v458_v39  ;;  %851 = vmatprep.subr.mxu1 %v316_v40  ;;  %v639_v30 = vld [vmem:[#allocation7 + $0xbe0] sm:$0xff]  ;;  %v630_v34 = vld [vmem:[#allocation7 + $0xb98] sm:$0xff]  ;;  %v477_v37 = vld [vmem:[#allocation7 + $0x6d0] sm:$0xff] }
  0x9c   : > { %742 = vmatpush2.msra.mxu0 %v457_v41  ;;  %852 = vmatpush1.msra.mxu1 %v315_v42  ;;  %v487_v31 = vld [vmem:[#allocation7 + $0x720] sm:$0xff]  ;;  %v478_v35 = vld [vmem:[#allocation7 + $0x6d8] sm:$0xff]  ;;  %v621_v38 = vld [vmem:[#allocation7 + $0xb50] sm:$0xff] }
  0x9d   : > { %743 = vmatprep.subr.mxu0 %v449_v43  ;;  %853 = vmatprep.subr.mxu1 %v307_v44  ;;  %v631_v32 = vld [vmem:[#allocation7 + $0xba0] sm:$0xff]  ;;  %v622_v36 = vld [vmem:[#allocation7 + $0xb58] sm:$0xff]  ;;  %v469_v39 = vld [vmem:[#allocation7 + $0x690] sm:$0xff] }
  0x9e   : > { %744 = vmatpush2.msra.mxu0 %v448_v45  ;;  %854 = vmatpush1.msra.mxu1 %v306_v46  ;;  %v613_v40 = vld [vmem:[#allocation7 + $0xb10] sm:$0xff]  ;;  %v468_v41 = vld [vmem:[#allocation7 + $0x688] sm:$0xff]  ;;  %v459_v45 = vld [vmem:[#allocation7 + $0x640] sm:$0xff] }
  0x9f   : > { %745 = vmatprep.subr.mxu0 %v440_v47  ;;  %855 = vmatprep.subr.mxu1 %v298_v48  ;;  %v612_v42 = vld [vmem:[#allocation7 + $0xb08] sm:$0xff]  ;;  %v603_v46 = vld [vmem:[#allocation7 + $0xac0] sm:$0xff] }
  0xa0   : > { %746 = vmatpush2.msra.mxu0 %v439_v49  ;;  %856 = vmatpush1.msra.mxu1 %v297_v50  ;;  %v460_v43 = vld [vmem:[#allocation7 + $0x648] sm:$0xff]  ;;  %v451_v47 = vld [vmem:[#allocation7 + $0x600] sm:$0xff]  ;;  %v450_v49 = vld [vmem:[#allocation7 + $0x5f8] sm:$0xff] }
  0xa1   : > { %747 = vmatprep.subr.mxu0 %v431_v51  ;;  %857 = vmatprep.subr.mxu1 %v289_v52  ;;  %v604_v44 = vld [vmem:[#allocation7 + $0xac8] sm:$0xff]  ;;  %v595_v48 = vld [vmem:[#allocation7 + $0xa80] sm:$0xff]  ;;  %v594_v50 = vld [vmem:[#allocation7 + $0xa78] sm:$0xff] }
  0xa2   : > { %748 = vmatpush2.msra.mxu0 %v430_v53  ;;  %858 = vmatpush1.msra.mxu1 %v288_v54  ;;  %v442_v51 = vld [vmem:[#allocation7 + $0x5b8] sm:$0xff]  ;;  %v441_v53 = vld [vmem:[#allocation7 + $0x5b0] sm:$0xff] }
  0xa3   : > { %749 = vmatprep.subr.mxu0 %v422_v55  ;;  %859 = vmatprep.subr.mxu1 %v280_v56  ;;  %v586_v52 = vld [vmem:[#allocation7 + $0xa38] sm:$0xff]  ;;  %v585_v54 = vld [vmem:[#allocation7 + $0xa30] sm:$0xff] }
  0xa4   : > { %750 = vmatpush2.msra.mxu0 %v421_v57  ;;  %860 = vmatpush1.msra.mxu1 %v279_v58  ;;  %v433_v55 = vld [vmem:[#allocation7 + $0x570] sm:$0xff]  ;;  %v432_v57 = vld [vmem:[#allocation7 + $0x568] sm:$0xff] }
  0xa5   : > { %751 = vmatprep.subr.mxu0 %v413_v59  ;;  %861 = vmatprep.subr.mxu1 %v271_v60  ;;  %v577_v56 = vld [vmem:[#allocation7 + $0x9f0] sm:$0xff]  ;;  %v576_v58 = vld [vmem:[#allocation7 + $0x9e8] sm:$0xff] }
  0xa6   : > { %752 = vmatpush2.msra.mxu0 %v412_v61  ;;  %862 = vmatpush1.msra.mxu1 %v270_v62  ;;  %v424_v59 = vld [vmem:[#allocation7 + $0x528] sm:$0xff]  ;;  %v423_v61 = vld [vmem:[#allocation7 + $0x520] sm:$0xff] }
  0xa7   : > { %753 = vmatprep.subr.mxu0 %v404_v63  ;;  %863 = vmatprep.subr.mxu1 %v262_v1  ;;  %v568_v60 = vld [vmem:[#allocation7 + $0x9a8] sm:$0xff]  ;;  %v567_v62 = vld [vmem:[#allocation7 + $0x9a0] sm:$0xff] }
  0xa8   : > { %754 = vmatpush2.msra.mxu0 %v403_v2  ;;  %755 = vmatprep.mubr.f32.mxu0 %v4486_v4  ;;  %v415_v63 = vld [vmem:[#allocation7 + $0x4e0] sm:$0xff]  ;;  %v414_v2 = vld [vmem:[#allocation7 + $0x4d8] sm:$0xff] }
  0xa9   : > { %864 = vmatpush1.msra.mxu1 %v261_v5  ;;  %756 = vmatmul.mubr.f32.vlgmr.msra.gmra.mxu0 %v4489_v6  ;;  %v559_v1 = vld [vmem:[#allocation7 + $0x960] sm:$0xff]  ;;  %v558_v5 = vld [vmem:[#allocation7 + $0x958] sm:$0xff] }
  0xaa   : > { %865 = vmatprep.subr.mxu1 %v541_v7  ;;  %904 = vmatprep.subr.mxu0 %v685_v8  ;;  %v406_v7 = vld [vmem:[#allocation7 + $0x498] sm:$0xff] }
  0xab   : > { %866 = vmatpush2.msra.mxu1 %v540_v9  ;;  %905 = vmatpush1.msra.mxu0 %v684_v10  ;;  %v550_v8 = vld [vmem:[#allocation7 + $0x918] sm:$0xff]  ;;  %v405_v9 = vld [vmem:[#allocation7 + $0x490] sm:$0xff] }
  0xac   : > { %867 = vmatprep.subr.mxu1 %v532_v11  ;;  %906 = vmatprep.subr.mxu0 %v676_v12  ;;  %v549_v10 = vld [vmem:[#allocation7 + $0x910] sm:$0xff]  ;;  %v399_v11 = vld [vmem:[#allocation7 + $0x460] sm:$0xff] }
  0xad   : > { %868 = vmatpush2.msra.mxu1 %v531_v13  ;;  %907 = vmatpush1.msra.mxu0 %v675_v14  ;;  %v687_v12 = vld [vmem:[#allocation7 + $0xd60] sm:$0xff]  ;;  %v398_v13 = vld [vmem:[#allocation7 + $0x458] sm:$0xff] }
  0xae   : > { %869 = vmatprep.subr.mxu1 %v523_v15  ;;  %908 = vmatprep.subr.mxu0 %v667_v16  ;;  %v686_v14 = vld [vmem:[#allocation7 + $0xd58] sm:$0xff] }
  0xaf   : > { %870 = vmatpush2.msra.mxu1 %v522_v17  ;;  %909 = vmatpush1.msra.mxu0 %v666_v18  ;;  %v390_v15 = vld [vmem:[#allocation7 + $0x418] sm:$0xff]  ;;  %v389_v17 = vld [vmem:[#allocation7 + $0x410] sm:$0xff] }
  0xb0   : > { %871 = vmatprep.subr.mxu1 %v514_v19  ;;  %910 = vmatprep.subr.mxu0 %v658_v20  ;;  %v678_v16 = vld [vmem:[#allocation7 + $0xd18] sm:$0xff]  ;;  %v677_v18 = vld [vmem:[#allocation7 + $0xd10] sm:$0xff] }
  0xb1   : > { %872 = vmatpush2.msra.mxu1 %v513_v21  ;;  %911 = vmatpush1.msra.mxu0 %v657_v22  ;;  %v381_v19 = vld [vmem:[#allocation7 + $0x3d0] sm:$0xff]  ;;  %v380_v21 = vld [vmem:[#allocation7 + $0x3c8] sm:$0xff] }
  0xb2   : > { %873 = vmatprep.subr.mxu1 %v505_v23  ;;  %912 = vmatprep.subr.mxu0 %v649_v24  ;;  %v669_v20 = vld [vmem:[#allocation7 + $0xcd0] sm:$0xff]  ;;  %v668_v22 = vld [vmem:[#allocation7 + $0xcc8] sm:$0xff] }
  0xb3   : > { %874 = vmatpush2.msra.mxu1 %v504_v25  ;;  %913 = vmatpush1.msra.mxu0 %v648_v26  ;;  %v372_v23 = vld [vmem:[#allocation7 + $0x388] sm:$0xff]  ;;  %v371_v25 = vld [vmem:[#allocation7 + $0x380] sm:$0xff] }
  0xb4   : > { %875 = vmatprep.subr.mxu1 %v496_v27  ;;  %914 = vmatprep.subr.mxu0 %v640_v28  ;;  %v660_v24 = vld [vmem:[#allocation7 + $0xc88] sm:$0xff]  ;;  %v659_v26 = vld [vmem:[#allocation7 + $0xc80] sm:$0xff] }
  0xb5   : > { %876 = vmatpush2.msra.mxu1 %v495_v29  ;;  %915 = vmatpush1.msra.mxu0 %v639_v30  ;;  %v363_v27 = vld [vmem:[#allocation7 + $0x340] sm:$0xff]  ;;  %v362_v29 = vld [vmem:[#allocation7 + $0x338] sm:$0xff] }
  0xb6   : > { %877 = vmatprep.subr.mxu1 %v487_v31  ;;  %916 = vmatprep.subr.mxu0 %v631_v32  ;;  %v651_v28 = vld [vmem:[#allocation7 + $0xc40] sm:$0xff]  ;;  %v650_v30 = vld [vmem:[#allocation7 + $0xc38] sm:$0xff] }
  0xb7   : > { %878 = vmatpush2.msra.mxu1 %v486_v33  ;;  %917 = vmatpush1.msra.mxu0 %v630_v34  ;;  %v354_v31 = vld [vmem:[#allocation7 + $0x2f8] sm:$0xff]  ;;  %v353_v33 = vld [vmem:[#allocation7 + $0x2f0] sm:$0xff] }
  0xb8   : > { %879 = vmatprep.subr.mxu1 %v478_v35  ;;  %918 = vmatprep.subr.mxu0 %v622_v36  ;;  %v642_v32 = vld [vmem:[#allocation7 + $0xbf8] sm:$0xff]  ;;  %v641_v34 = vld [vmem:[#allocation7 + $0xbf0] sm:$0xff] }
  0xb9   : > { %880 = vmatpush2.msra.mxu1 %v477_v37  ;;  %919 = vmatpush1.msra.mxu0 %v621_v38  ;;  %v345_v35 = vld [vmem:[#allocation7 + $0x2b0] sm:$0xff]  ;;  %v344_v37 = vld [vmem:[#allocation7 + $0x2a8] sm:$0xff] }
  0xba   : > { %881 = vmatprep.subr.mxu1 %v469_v39  ;;  %920 = vmatprep.subr.mxu0 %v613_v40  ;;  %v633_v36 = vld [vmem:[#allocation7 + $0xbb0] sm:$0xff]  ;;  %v632_v38 = vld [vmem:[#allocation7 + $0xba8] sm:$0xff] }
  0xbb   : > { %882 = vmatpush2.msra.mxu1 %v468_v41  ;;  %921 = vmatpush1.msra.mxu0 %v612_v42  ;;  %v336_v39 = vld [vmem:[#allocation7 + $0x268] sm:$0xff]  ;;  %v335_v41 = vld [vmem:[#allocation7 + $0x260] sm:$0xff] }
  0xbc   : > { %883 = vmatprep.subr.mxu1 %v460_v43  ;;  %922 = vmatprep.subr.mxu0 %v604_v44  ;;  %v624_v40 = vld [vmem:[#allocation7 + $0xb68] sm:$0xff]  ;;  %v623_v42 = vld [vmem:[#allocation7 + $0xb60] sm:$0xff] }
  0xbd   : > { %884 = vmatpush2.msra.mxu1 %v459_v45  ;;  %923 = vmatpush1.msra.mxu0 %v603_v46  ;;  %v327_v43 = vld [vmem:[#allocation7 + $0x220] sm:$0xff]  ;;  %v326_v45 = vld [vmem:[#allocation7 + $0x218] sm:$0xff] }
  0xbe   : > { %885 = vmatprep.subr.mxu1 %v451_v47  ;;  %924 = vmatprep.subr.mxu0 %v595_v48  ;;  %v615_v44 = vld [vmem:[#allocation7 + $0xb20] sm:$0xff]  ;;  %v614_v46 = vld [vmem:[#allocation7 + $0xb18] sm:$0xff] }
  0xbf   : > { %886 = vmatpush2.msra.mxu1 %v450_v49  ;;  %925 = vmatpush1.msra.mxu0 %v594_v50  ;;  %v318_v47 = vld [vmem:[#allocation7 + $0x1d8] sm:$0xff]  ;;  %v317_v49 = vld [vmem:[#allocation7 + $0x1d0] sm:$0xff] }
  0xc0   : > { %887 = vmatprep.subr.mxu1 %v442_v51  ;;  %926 = vmatprep.subr.mxu0 %v586_v52  ;;  %v606_v48 = vld [vmem:[#allocation7 + $0xad8] sm:$0xff]  ;;  %v605_v50 = vld [vmem:[#allocation7 + $0xad0] sm:$0xff] }
  0xc1   : > { %888 = vmatpush2.msra.mxu1 %v441_v53  ;;  %927 = vmatpush1.msra.mxu0 %v585_v54  ;;  %v309_v51 = vld [vmem:[#allocation7 + $0x190] sm:$0xff]  ;;  %v308_v53 = vld [vmem:[#allocation7 + $0x188] sm:$0xff] }
  0xc2   : > { %889 = vmatprep.subr.mxu1 %v433_v55  ;;  %928 = vmatprep.subr.mxu0 %v577_v56  ;;  %v597_v52 = vld [vmem:[#allocation7 + $0xa90] sm:$0xff]  ;;  %v596_v54 = vld [vmem:[#allocation7 + $0xa88] sm:$0xff] }
  0xc3   : > { %890 = vmatpush2.msra.mxu1 %v432_v57  ;;  %929 = vmatpush1.msra.mxu0 %v576_v58  ;;  %v300_v55 = vld [vmem:[#allocation7 + $0x148] sm:$0xff]  ;;  %v299_v57 = vld [vmem:[#allocation7 + $0x140] sm:$0xff] }
  0xc4   : > { %891 = vmatprep.subr.mxu1 %v424_v59  ;;  %930 = vmatprep.subr.mxu0 %v568_v60  ;;  %v588_v56 = vld [vmem:[#allocation7 + $0xa48] sm:$0xff]  ;;  %v587_v58 = vld [vmem:[#allocation7 + $0xa40] sm:$0xff] }
  0xc5   : > { %892 = vmatpush2.msra.mxu1 %v423_v61  ;;  %931 = vmatpush1.msra.mxu0 %v567_v62  ;;  %v291_v59 = vld [vmem:[#allocation7 + $0x100] sm:$0xff]  ;;  %v290_v61 = vld [vmem:[#allocation7 + $0xf8] sm:$0xff] }
  0xc6   : > { %893 = vmatprep.subr.mxu1 %v415_v63  ;;  %932 = vmatprep.subr.mxu0 %v559_v1  ;;  %v579_v60 = vld [vmem:[#allocation7 + $0xa00] sm:$0xff]  ;;  %v578_v62 = vld [vmem:[#allocation7 + $0x9f8] sm:$0xff] }
  0xc7   : > { %894 = vmatpush2.msra.mxu1 %v414_v2  ;;  %933 = vmatpush1.msra.mxu0 %v558_v5  ;;  %v282_v63 = vld [vmem:[#allocation7 + $0xb8] sm:$0xff]  ;;  %v281_v2 = vld [vmem:[#allocation7 + $0xb0] sm:$0xff] }
  0xc8   : > { %895 = vmatprep.subr.mxu1 %v406_v7  ;;  %934 = vmatprep.subr.mxu0 %v550_v8  ;;  %v570_v1 = vld [vmem:[#allocation7 + $0x9b8] sm:$0xff]  ;;  %v569_v5 = vld [vmem:[#allocation7 + $0x9b0] sm:$0xff] }
  0xc9   : > { %896 = vmatpush2.msra.mxu1 %v405_v9  ;;  %897 = vmatprep.mubr.f32.mxu1 %v4486_v4  ;;  %v273_v7 = vld [vmem:[#allocation7 + $0x70] sm:$0xff]  ;;  %v272_v9 = vld [vmem:[#allocation7 + $0x68] sm:$0xff] }
  0xca   : > { %935 = vmatpush1.msra.mxu0 %v549_v10  ;;  %968 = vmatprep.mubr.f32.mxu0 %v4305_v0  ;;  %v561_v8 = vld [vmem:[#allocation7 + $0x970] sm:$0xff]  ;;  %v560_v10 = vld [vmem:[#allocation7 + $0x968] sm:$0xff] }
  0xcb   : > { %898 = vmatmul.mubr.f32.vlgmr.msra.gmra.mxu1 %v4489_v6  ;;  %969 = vmatmul.mubr.f32.vlgmr.msra.gmra.mxu0 %v4482_v3 }
  0xcc   : > { %975 = vmatprep.subr.mxu0 %v399_v11  ;;  %1046 = vmatprep.subr.mxu1 %v687_v12  ;;  %v264_v11 = vld [vmem:[#allocation7 + $0x28] sm:$0xff] }
  0xcd   : > { %976 = vmatpush1.msra.mxu0 %v398_v13  ;;  %1047 = vmatpush1.msra.mxu1 %v686_v14  ;;  %v552_v12 = vld [vmem:[#allocation7 + $0x928] sm:$0xff]  ;;  %v263_v13 = vld [vmem:[#allocation7 + $0x20] sm:$0xff] }
  0xce   : > { %977 = vmatprep.subr.mxu0 %v390_v15  ;;  %1048 = vmatprep.subr.mxu1 %v678_v16  ;;  %v551_v14 = vld [vmem:[#allocation7 + $0x920] sm:$0xff]  ;;  %v401_v16 = vld [vmem:[#allocation7 + $0x470] sm:$0xff] }
  0xcf   : > { %978 = vmatpush1.msra.mxu0 %v389_v17  ;;  %1049 = vmatpush1.msra.mxu1 %v677_v18  ;;  %v543_v15 = vld [vmem:[#allocation7 + $0x8e0] sm:$0xff]  ;;  %v542_v17 = vld [vmem:[#allocation7 + $0x8d8] sm:$0xff]  ;;  %v400_v18 = vld [vmem:[#allocation7 + $0x468] sm:$0xff] }
  0xd0   : > { %979 = vmatprep.subr.mxu0 %v381_v19  ;;  %1050 = vmatprep.subr.mxu1 %v669_v20  ;;  %v534_v19 = vld [vmem:[#allocation7 + $0x898] sm:$0xff]  ;;  %v392_v20 = vld [vmem:[#allocation7 + $0x428] sm:$0xff] }
  0xd1   : > { %980 = vmatpush1.msra.mxu0 %v380_v21  ;;  %1051 = vmatpush1.msra.mxu1 %v668_v22  ;;  %v533_v21 = vld [vmem:[#allocation7 + $0x890] sm:$0xff]  ;;  %v391_v22 = vld [vmem:[#allocation7 + $0x420] sm:$0xff] }
  0xd2   : > { %981 = vmatprep.subr.mxu0 %v372_v23  ;;  %1052 = vmatprep.subr.mxu1 %v660_v24  ;;  %v525_v23 = vld [vmem:[#allocation7 + $0x850] sm:$0xff]  ;;  %v383_v24 = vld [vmem:[#allocation7 + $0x3e0] sm:$0xff] }
  0xd3   : > { %982 = vmatpush1.msra.mxu0 %v371_v25  ;;  %1053 = vmatpush1.msra.mxu1 %v659_v26  ;;  %v524_v25 = vld [vmem:[#allocation7 + $0x848] sm:$0xff]  ;;  %v382_v26 = vld [vmem:[#allocation7 + $0x3d8] sm:$0xff] }
  0xd4   : > { %983 = vmatprep.subr.mxu0 %v363_v27  ;;  %1054 = vmatprep.subr.mxu1 %v651_v28  ;;  %v516_v27 = vld [vmem:[#allocation7 + $0x808] sm:$0xff]  ;;  %v374_v28 = vld [vmem:[#allocation7 + $0x398] sm:$0xff] }
  0xd5   : > { %984 = vmatpush1.msra.mxu0 %v362_v29  ;;  %1055 = vmatpush1.msra.mxu1 %v650_v30  ;;  %v515_v29 = vld [vmem:[#allocation7 + $0x800] sm:$0xff]  ;;  %v373_v30 = vld [vmem:[#allocation7 + $0x390] sm:$0xff] }
  0xd6   : > { %985 = vmatprep.subr.mxu0 %v354_v31  ;;  %1056 = vmatprep.subr.mxu1 %v642_v32  ;;  %v507_v31 = vld [vmem:[#allocation7 + $0x7c0] sm:$0xff]  ;;  %v506_v32 = vld [vmem:[#allocation7 + $0x7b8] sm:$0xff] }
  0xd7   : > { %986 = vmatpush1.msra.mxu0 %v353_v33  ;;  %1057 = vmatpush1.msra.mxu1 %v641_v34  ;;  %v364_v33 = vld [vmem:[#allocation7 + $0x348] sm:$0xff]  ;;  %v498_v34 = vld [vmem:[#allocation7 + $0x778] sm:$0xff] }
  0xd8   : > { %987 = vmatprep.subr.mxu0 %v345_v35  ;;  %1058 = vmatprep.subr.mxu1 %v633_v36  ;;  %v356_v35 = vld [vmem:[#allocation7 + $0x308] sm:$0xff]  ;;  %v497_v36 = vld [vmem:[#allocation7 + $0x770] sm:$0xff] }
  0xd9   : > { %988 = vmatpush1.msra.mxu0 %v344_v37  ;;  %1059 = vmatpush1.msra.mxu1 %v632_v38  ;;  %v355_v37 = vld [vmem:[#allocation7 + $0x300] sm:$0xff]  ;;  %v489_v38 = vld [vmem:[#allocation7 + $0x730] sm:$0xff] }
  0xda   : > { %989 = vmatprep.subr.mxu0 %v336_v39  ;;  %1060 = vmatprep.subr.mxu1 %v624_v40  ;;  %v347_v39 = vld [vmem:[#allocation7 + $0x2c0] sm:$0xff]  ;;  %v488_v40 = vld [vmem:[#allocation7 + $0x728] sm:$0xff] }
  0xdb   : > { %990 = vmatpush1.msra.mxu0 %v335_v41  ;;  %1061 = vmatpush1.msra.mxu1 %v623_v42  ;;  %v346_v41 = vld [vmem:[#allocation7 + $0x2b8] sm:$0xff]  ;;  %v480_v42 = vld [vmem:[#allocation7 + $0x6e8] sm:$0xff] }
  0xdc   : > { %991 = vmatprep.subr.mxu0 %v327_v43  ;;  %1062 = vmatprep.subr.mxu1 %v615_v44  ;;  %v338_v43 = vld [vmem:[#allocation7 + $0x278] sm:$0xff]  ;;  %v479_v44 = vld [vmem:[#allocation7 + $0x6e0] sm:$0xff] }
  0xdd   : > { %992 = vmatpush1.msra.mxu0 %v326_v45  ;;  %1063 = vmatpush1.msra.mxu1 %v614_v46  ;;  %v337_v45 = vld [vmem:[#allocation7 + $0x270] sm:$0xff]  ;;  %v471_v46 = vld [vmem:[#allocation7 + $0x6a0] sm:$0xff] }
  0xde   : > { %993 = vmatprep.subr.mxu0 %v318_v47  ;;  %1064 = vmatprep.subr.mxu1 %v606_v48  ;;  %v329_v47 = vld [vmem:[#allocation7 + $0x230] sm:$0xff]  ;;  %v470_v48 = vld [vmem:[#allocation7 + $0x698] sm:$0xff] }
  0xdf   : > { %994 = vmatpush1.msra.mxu0 %v317_v49  ;;  %1065 = vmatpush1.msra.mxu1 %v605_v50  ;;  %v328_v49 = vld [vmem:[#allocation7 + $0x228] sm:$0xff]  ;;  %v462_v50 = vld [vmem:[#allocation7 + $0x658] sm:$0xff] }
  0xe0   : > { %995 = vmatprep.subr.mxu0 %v309_v51  ;;  %1066 = vmatprep.subr.mxu1 %v597_v52  ;;  %v320_v51 = vld [vmem:[#allocation7 + $0x1e8] sm:$0xff]  ;;  %v461_v52 = vld [vmem:[#allocation7 + $0x650] sm:$0xff] }
  0xe1   : > { %996 = vmatpush1.msra.mxu0 %v308_v53  ;;  %1067 = vmatpush1.msra.mxu1 %v596_v54  ;;  %v319_v53 = vld [vmem:[#allocation7 + $0x1e0] sm:$0xff]  ;;  %v453_v54 = vld [vmem:[#allocation7 + $0x610] sm:$0xff] }
  0xe2   : > { %997 = vmatprep.subr.mxu0 %v300_v55  ;;  %1068 = vmatprep.subr.mxu1 %v588_v56  ;;  %v311_v55 = vld [vmem:[#allocation7 + $0x1a0] sm:$0xff]  ;;  %v452_v56 = vld [vmem:[#allocation7 + $0x608] sm:$0xff] }
  0xe3   : > { %998 = vmatpush1.msra.mxu0 %v299_v57  ;;  %1069 = vmatpush1.msra.mxu1 %v587_v58  ;;  %v310_v57 = vld [vmem:[#allocation7 + $0x198] sm:$0xff]  ;;  %v444_v58 = vld [vmem:[#allocation7 + $0x5c8] sm:$0xff] }
  0xe4   : > { %999 = vmatprep.subr.mxu0 %v291_v59  ;;  %1070 = vmatprep.subr.mxu1 %v579_v60  ;;  %v302_v59 = vld [vmem:[#allocation7 + $0x158] sm:$0xff]  ;;  %v443_v60 = vld [vmem:[#allocation7 + $0x5c0] sm:$0xff] }
  0xe5   : > { %1000 = vmatpush1.msra.mxu0 %v290_v61  ;;  %1071 = vmatpush1.msra.mxu1 %v578_v62  ;;  %v301_v61 = vld [vmem:[#allocation7 + $0x150] sm:$0xff]  ;;  %v435_v62 = vld [vmem:[#allocation7 + $0x580] sm:$0xff] }
  0xe6   : > { %1001 = vmatprep.subr.mxu0 %v282_v63  ;;  %1072 = vmatprep.subr.mxu1 %v570_v1  ;;  %v293_v63 = vld [vmem:[#allocation7 + $0x110] sm:$0xff]  ;;  %v434_v1 = vld [vmem:[#allocation7 + $0x578] sm:$0xff] }
  0xe7   : > { %1002 = vmatpush1.msra.mxu0 %v281_v2  ;;  %1073 = vmatpush1.msra.mxu1 %v569_v5  ;;  %v292_v2 = vld [vmem:[#allocation7 + $0x108] sm:$0xff]  ;;  %v426_v5 = vld [vmem:[#allocation7 + $0x538] sm:$0xff] }
  0xe8   : > { %1003 = vmatprep.subr.mxu0 %v273_v7  ;;  %1074 = vmatprep.subr.mxu1 %v561_v8  ;;  %v284_v7 = vld [vmem:[#allocation7 + $0xc8] sm:$0xff]  ;;  %v425_v8 = vld [vmem:[#allocation7 + $0x530] sm:$0xff] }
  0xe9   : > { %1004 = vmatpush1.msra.mxu0 %v272_v9  ;;  %1075 = vmatpush1.msra.mxu1 %v560_v10  ;;  %v283_v9 = vld [vmem:[#allocation7 + $0xc0] sm:$0xff]  ;;  %v417_v10 = vld [vmem:[#allocation7 + $0x4f0] sm:$0xff] }
  0xea   : > { %1005 = vmatprep.subr.mxu0 %v264_v11  ;;  %1076 = vmatprep.subr.mxu1 %v552_v12  ;;  %v275_v11 = vld [vmem:[#allocation7 + $0x80] sm:$0xff]  ;;  %v416_v12 = vld [vmem:[#allocation7 + $0x4e8] sm:$0xff] }
  0xeb   : > { %1006 = vmatpush1.msra.mxu0 %v263_v13  ;;  %1077 = vmatpush1.msra.mxu1 %v551_v14  ;;  %v274_v13 = vld [vmem:[#allocation7 + $0x78] sm:$0xff]  ;;  %v408_v14 = vld [vmem:[#allocation7 + $0x4a8] sm:$0xff] }
  0xec   : > { %1007 = vmatprep.subr.mxu0 %v543_v15  ;;  %1110 = vmatprep.mubr.f32.mxu1 %v4305_v0  ;;  %v266_v15 = vld [vmem:[#allocation7 + $0x38] sm:$0xff] }
  0xed   : > { %1117 = vmatprep.subr.mxu1 %v401_v16  ;;  %1008 = vmatpush2.msra.mxu0 %v542_v17  ;;  %v407_v16 = vld [vmem:[#allocation7 + $0x4a0] sm:$0xff]  ;;  %v265_v17 = vld [vmem:[#allocation7 + $0x30] sm:$0xff] }
  0xee   : > { %1111 = vmatmul.mubr.f32.vlgmr.msra.gmra.mxu1 %v4482_v3  ;;  %1009 = vmatprep.subr.mxu0 %v534_v19  ;;  %v365_v3 = vld [vmem:[#allocation7 + $0x350] sm:$0xff] }
  0xef   : > { %1118 = vmatpush1.msra.mxu1 %v400_v18  ;;  %1010 = vmatpush2.msra.mxu0 %v533_v21  ;;  %v545_v18 = vld [vmem:[#allocation7 + $0x8f0] sm:$0xff]  ;;  %v688_v21 = vld [vmem:[#allocation7 + $0xd68] sm:$0xff] }
  0xf0   : > { %1119 = vmatprep.subr.mxu1 %v392_v20  ;;  %1011 = vmatprep.subr.mxu0 %v525_v23  ;;  %v689_v19 = vld [vmem:[#allocation7 + $0xd70] sm:$0xff]  ;;  %v544_v20 = vld [vmem:[#allocation7 + $0x8e8] sm:$0xff] }
  0xf1   : > { %1120 = vmatpush1.msra.mxu1 %v391_v22  ;;  %1012 = vmatpush2.msra.mxu0 %v524_v25  ;;  %v536_v22 = vld [vmem:[#allocation7 + $0x8a8] sm:$0xff]  ;;  %v679_v25 = vld [vmem:[#allocation7 + $0xd20] sm:$0xff] }
  0xf2   : > { %1121 = vmatprep.subr.mxu1 %v383_v24  ;;  %1013 = vmatprep.subr.mxu0 %v516_v27  ;;  %v680_v23 = vld [vmem:[#allocation7 + $0xd28] sm:$0xff]  ;;  %v535_v24 = vld [vmem:[#allocation7 + $0x8a0] sm:$0xff] }
  0xf3   : > { %1122 = vmatpush1.msra.mxu1 %v382_v26  ;;  %1014 = vmatpush2.msra.mxu0 %v515_v29  ;;  %v527_v26 = vld [vmem:[#allocation7 + $0x860] sm:$0xff]  ;;  %v670_v29 = vld [vmem:[#allocation7 + $0xcd8] sm:$0xff] }
  0xf4   : > { %1123 = vmatprep.subr.mxu1 %v374_v28  ;;  %1015 = vmatprep.subr.mxu0 %v507_v31  ;;  %v671_v27 = vld [vmem:[#allocation7 + $0xce0] sm:$0xff]  ;;  %v526_v28 = vld [vmem:[#allocation7 + $0x858] sm:$0xff]  ;;  %v517_v31 = vld [vmem:[#allocation7 + $0x810] sm:$0xff] }
  0xf5   : > { %1124 = vmatpush1.msra.mxu1 %v373_v30  ;;  %1016 = vmatpush2.msra.mxu0 %v506_v32  ;;  %v662_v30 = vld [vmem:[#allocation7 + $0xc98] sm:$0xff]  ;;  %v653_v32 = vld [vmem:[#allocation7 + $0xc50] sm:$0xff] }
  0xf6   : > { %1125 = vmatprep.subr.mxu1 %v365_v3  ;;  %1017 = vmatprep.subr.mxu0 %v498_v34  ;;  %v509_v3 = vld [vmem:[#allocation7 + $0x7d0] sm:$0xff]  ;;  %v652_v34 = vld [vmem:[#allocation7 + $0xc48] sm:$0xff] }
  0xf7   : > { %1126 = vmatpush1.msra.mxu1 %v364_v33  ;;  %1018 = vmatpush2.msra.mxu0 %v497_v36  ;;  %v508_v33 = vld [vmem:[#allocation7 + $0x7c8] sm:$0xff] }
  0xf8   : > { %1127 = vmatprep.subr.mxu1 %v356_v35  ;;  %1019 = vmatprep.subr.mxu0 %v489_v38  ;;  %v500_v35 = vld [vmem:[#allocation7 + $0x788] sm:$0xff]  ;;  %v643_v38 = vld [vmem:[#allocation7 + $0xc00] sm:$0xff] }
  0xf9   : > { %1128 = vmatpush1.msra.mxu1 %v355_v37  ;;  %1020 = vmatpush2.msra.mxu0 %v488_v40  ;;  %v644_v36 = vld [vmem:[#allocation7 + $0xc08] sm:$0xff]  ;;  %v499_v37 = vld [vmem:[#allocation7 + $0x780] sm:$0xff] }
  0xfa   : > { %1129 = vmatprep.subr.mxu1 %v347_v39  ;;  %1021 = vmatprep.subr.mxu0 %v480_v42  ;;  %v491_v39 = vld [vmem:[#allocation7 + $0x740] sm:$0xff]  ;;  %v634_v42 = vld [vmem:[#allocation7 + $0xbb8] sm:$0xff] }
  0xfb   : > { %1130 = vmatpush1.msra.mxu1 %v346_v41  ;;  %1022 = vmatpush2.msra.mxu0 %v479_v44  ;;  %v635_v40 = vld [vmem:[#allocation7 + $0xbc0] sm:$0xff]  ;;  %v490_v41 = vld [vmem:[#allocation7 + $0x738] sm:$0xff] }
  0xfc   : > { %1131 = vmatprep.subr.mxu1 %v338_v43  ;;  %1023 = vmatprep.subr.mxu0 %v471_v46  ;;  %v482_v43 = vld [vmem:[#allocation7 + $0x6f8] sm:$0xff]  ;;  %v625_v46 = vld [vmem:[#allocation7 + $0xb70] sm:$0xff] }
  0xfd   : > { %1132 = vmatpush1.msra.mxu1 %v337_v45  ;;  %1024 = vmatpush2.msra.mxu0 %v470_v48  ;;  %v626_v44 = vld [vmem:[#allocation7 + $0xb78] sm:$0xff]  ;;  %v481_v45 = vld [vmem:[#allocation7 + $0x6f0] sm:$0xff] }
  0xfe   : > { %1133 = vmatprep.subr.mxu1 %v329_v47  ;;  %1025 = vmatprep.subr.mxu0 %v462_v50  ;;  %v473_v47 = vld [vmem:[#allocation7 + $0x6b0] sm:$0xff]  ;;  %v616_v50 = vld [vmem:[#allocation7 + $0xb28] sm:$0xff] }
  0xff   : > { %1134 = vmatpush1.msra.mxu1 %v328_v49  ;;  %1026 = vmatpush2.msra.mxu0 %v461_v52  ;;  %v617_v48 = vld [vmem:[#allocation7 + $0xb30] sm:$0xff]  ;;  %v472_v49 = vld [vmem:[#allocation7 + $0x6a8] sm:$0xff] }
 0x100   : > { %1135 = vmatprep.subr.mxu1 %v320_v51  ;;  %1027 = vmatprep.subr.mxu0 %v453_v54  ;;  %v464_v51 = vld [vmem:[#allocation7 + $0x668] sm:$0xff]  ;;  %v607_v54 = vld [vmem:[#allocation7 + $0xae0] sm:$0xff] }
 0x101   : > { %1136 = vmatpush1.msra.mxu1 %v319_v53  ;;  %1028 = vmatpush2.msra.mxu0 %v452_v56  ;;  %v608_v52 = vld [vmem:[#allocation7 + $0xae8] sm:$0xff]  ;;  %v463_v53 = vld [vmem:[#allocation7 + $0x660] sm:$0xff] }
 0x102   : > { %1137 = vmatprep.subr.mxu1 %v311_v55  ;;  %1029 = vmatprep.subr.mxu0 %v444_v58  ;;  %v455_v55 = vld [vmem:[#allocation7 + $0x620] sm:$0xff]  ;;  %v598_v58 = vld [vmem:[#allocation7 + $0xa98] sm:$0xff] }
 0x103   : > { %1138 = vmatpush1.msra.mxu1 %v310_v57  ;;  %1030 = vmatpush2.msra.mxu0 %v443_v60  ;;  %v599_v56 = vld [vmem:[#allocation7 + $0xaa0] sm:$0xff]  ;;  %v454_v57 = vld [vmem:[#allocation7 + $0x618] sm:$0xff] }
 0x104   : > { %1139 = vmatprep.subr.mxu1 %v302_v59  ;;  %1031 = vmatprep.subr.mxu0 %v435_v62  ;;  %v446_v59 = vld [vmem:[#allocation7 + $0x5d8] sm:$0xff]  ;;  %v589_v62 = vld [vmem:[#allocation7 + $0xa50] sm:$0xff] }
 0x105   : > { %1140 = vmatpush1.msra.mxu1 %v301_v61  ;;  %1032 = vmatpush2.msra.mxu0 %v434_v1  ;;  %v590_v60 = vld [vmem:[#allocation7 + $0xa58] sm:$0xff]  ;;  %v445_v61 = vld [vmem:[#allocation7 + $0x5d0] sm:$0xff] }
 0x106   : > { %1141 = vmatprep.subr.mxu1 %v293_v63  ;;  %1033 = vmatprep.subr.mxu0 %v426_v5  ;;  %v437_v63 = vld [vmem:[#allocation7 + $0x590] sm:$0xff]  ;;  %v580_v5 = vld [vmem:[#allocation7 + $0xa08] sm:$0xff] }
 0x107   : > { %1142 = vmatpush1.msra.mxu1 %v292_v2  ;;  %1034 = vmatpush2.msra.mxu0 %v425_v8  ;;  %v581_v1 = vld [vmem:[#allocation7 + $0xa10] sm:$0xff]  ;;  %v436_v2 = vld [vmem:[#allocation7 + $0x588] sm:$0xff] }
 0x108   : > { %1143 = vmatprep.subr.mxu1 %v284_v7  ;;  %1035 = vmatprep.subr.mxu0 %v417_v10  ;;  %v428_v7 = vld [vmem:[#allocation7 + $0x548] sm:$0xff]  ;;  %v571_v10 = vld [vmem:[#allocation7 + $0x9c0] sm:$0xff] }
 0x109   : > { %1144 = vmatpush1.msra.mxu1 %v283_v9  ;;  %1036 = vmatpush2.msra.mxu0 %v416_v12  ;;  %v572_v8 = vld [vmem:[#allocation7 + $0x9c8] sm:$0xff]  ;;  %v427_v9 = vld [vmem:[#allocation7 + $0x540] sm:$0xff] }
 0x10a   : > { %1145 = vmatprep.subr.mxu1 %v275_v11  ;;  %1037 = vmatprep.subr.mxu0 %v408_v14  ;;  %v419_v11 = vld [vmem:[#allocation7 + $0x500] sm:$0xff]  ;;  %v562_v14 = vld [vmem:[#allocation7 + $0x978] sm:$0xff] }
 0x10b   : > { %1146 = vmatpush1.msra.mxu1 %v274_v13  ;;  %1038 = vmatpush2.msra.mxu0 %v407_v16  ;;  %v563_v12 = vld [vmem:[#allocation7 + $0x980] sm:$0xff]  ;;  %v418_v13 = vld [vmem:[#allocation7 + $0x4f8] sm:$0xff] }
 0x10c   : > { %1147 = vmatprep.subr.mxu1 %v266_v15  ;;  %1039 = vmatprep.mubr.f32.mxu0 %v4486_v4  ;;  %v518_v4 = vld [vmem:[#allocation7 + $0x818] sm:$0xff] }
 0x10d   : > { %1148 = vmatpush1.msra.mxu1 %v265_v17  ;;  %1040 = vmatmul.mubr.f32.vlgmr.msra.gmra.mxu0 %v4489_v6  ;;  %v661_v6 = vld [vmem:[#allocation7 + $0xc90] sm:$0xff]  ;;  %v410_v15 = vld [vmem:[#allocation7 + $0x4b8] sm:$0xff] }
 0x10e   : > { %1149 = vmatprep.subr.mxu1 %v545_v18  ;;  %1188 = vmatprep.subr.mxu0 %v689_v19  ;;  %v554_v16 = vld [vmem:[#allocation7 + $0x938] sm:$0xff]  ;;  %v409_v17 = vld [vmem:[#allocation7 + $0x4b0] sm:$0xff] }
 0x10f   : > { %1150 = vmatpush2.msra.mxu1 %v544_v20  ;;  %1189 = vmatpush1.msra.mxu0 %v688_v21  ;;  %v553_v18 = vld [vmem:[#allocation7 + $0x930] sm:$0xff]  ;;  %v546_v19 = vld [vmem:[#allocation7 + $0x8f8] sm:$0xff] }
 0x110   : > { %1151 = vmatprep.subr.mxu1 %v536_v22  ;;  %1190 = vmatprep.subr.mxu0 %v680_v23  ;;  %v4502_v20 = vld [vmem:[%s4466_s28 + $0x8] sm:$0xff]  ;;  %v4507_v22 = vld [vmem:[%s4466_s28] sm:$0xff] }
 0x111   : > { %1152 = vmatpush2.msra.mxu1 %v535_v24  ;;  %1191 = vmatpush1.msra.mxu0 %v679_v25  ;;  %v402_v21 = vld [vmem:[#allocation7 + $0x478] sm:$0xff]  ;;  %v537_v23 = vld [vmem:[#allocation7 + $0x8b0] sm:$0xff] }
 0x112   : > { %1153 = vmatprep.subr.mxu1 %v527_v26  ;;  %1192 = vmatprep.subr.mxu0 %v671_v27  ;;  %v690_v24 = vld [vmem:[#allocation7 + $0xd78] sm:$0xff]  ;;  %v393_v26 = vld [vmem:[#allocation7 + $0x430] sm:$0xff]  ;;  %v528_v27 = vld [vmem:[#allocation7 + $0x868] sm:$0xff] }
 0x113   : > { %1154 = vmatpush2.msra.mxu1 %v526_v28  ;;  %1193 = vmatpush1.msra.mxu0 %v670_v29  ;;  %v4511_v25 = vld [vmem:[%s4466_s28 + $0x10] sm:$0xff]  ;;  %v681_v28 = vld [vmem:[#allocation7 + $0xd30] sm:$0xff]  ;;  %v384_v29 = vld [vmem:[#allocation7 + $0x3e8] sm:$0xff] }
 0x114   : > { %1155 = vmatprep.subr.mxu1 %v518_v4  ;;  %1194 = vmatprep.subr.mxu0 %v662_v30  ;;  %v519_v4 = vld [vmem:[#allocation7 + $0x820] sm:$0xff]  ;;  %v672_v30 = vld [vmem:[#allocation7 + $0xce8] sm:$0xff] }
 0x115   : > { %1156 = vmatpush2.msra.mxu1 %v517_v31  ;;  %1195 = vmatpush1.msra.mxu0 %v661_v6  ;;  %v375_v31 = vld [vmem:[#allocation7 + $0x3a0] sm:$0xff]  ;;  %v510_v6 = vld [vmem:[#allocation7 + $0x7d8] sm:$0xff] }
 0x116   : > { %1157 = vmatprep.subr.mxu1 %v509_v3  ;;  %1196 = vmatprep.subr.mxu0 %v653_v32  ;;  %v663_v3 = vld [vmem:[#allocation7 + $0xca0] sm:$0xff]  ;;  %v366_v32 = vld [vmem:[#allocation7 + $0x358] sm:$0xff] }
 0x117   : > { %1158 = vmatpush2.msra.mxu1 %v508_v33  ;;  %1197 = vmatpush1.msra.mxu0 %v652_v34  ;;  %v501_v33 = vld [vmem:[#allocation7 + $0x790] sm:$0xff]  ;;  %v654_v34 = vld [vmem:[#allocation7 + $0xc58] sm:$0xff] }
 0x118   : > { %1159 = vmatprep.subr.mxu1 %v500_v35  ;;  %1198 = vmatprep.subr.mxu0 %v644_v36  ;;  %v357_v35 = vld [vmem:[#allocation7 + $0x310] sm:$0xff]  ;;  %v492_v36 = vld [vmem:[#allocation7 + $0x748] sm:$0xff] }
 0x119   : > { %1160 = vmatpush2.msra.mxu1 %v499_v37  ;;  %1199 = vmatpush1.msra.mxu0 %v643_v38  ;;  %v645_v37 = vld [vmem:[#allocation7 + $0xc10] sm:$0xff]  ;;  %v348_v38 = vld [vmem:[#allocation7 + $0x2c8] sm:$0xff] }
 0x11a   : > { %1161 = vmatprep.subr.mxu1 %v491_v39  ;;  %1200 = vmatprep.subr.mxu0 %v635_v40  ;;  %v483_v39 = vld [vmem:[#allocation7 + $0x700] sm:$0xff]  ;;  %v636_v40 = vld [vmem:[#allocation7 + $0xbc8] sm:$0xff] }
 0x11b   : > { %1162 = vmatpush2.msra.mxu1 %v490_v41  ;;  %1201 = vmatpush1.msra.mxu0 %v634_v42  ;;  %v339_v41 = vld [vmem:[#allocation7 + $0x280] sm:$0xff]  ;;  %v474_v42 = vld [vmem:[#allocation7 + $0x6b8] sm:$0xff] }
 0x11c   : > { %1163 = vmatprep.subr.mxu1 %v482_v43  ;;  %1202 = vmatprep.subr.mxu0 %v626_v44  ;;  %v627_v43 = vld [vmem:[#allocation7 + $0xb80] sm:$0xff]  ;;  %v330_v44 = vld [vmem:[#allocation7 + $0x238] sm:$0xff] }
 0x11d   : > { %1164 = vmatpush2.msra.mxu1 %v481_v45  ;;  %1203 = vmatpush1.msra.mxu0 %v625_v46  ;;  %v465_v45 = vld [vmem:[#allocation7 + $0x670] sm:$0xff]  ;;  %v618_v46 = vld [vmem:[#allocation7 + $0xb38] sm:$0xff] }
 0x11e   : > { %1165 = vmatprep.subr.mxu1 %v473_v47  ;;  %1204 = vmatprep.subr.mxu0 %v617_v48  ;;  %v321_v47 = vld [vmem:[#allocation7 + $0x1f0] sm:$0xff]  ;;  %v456_v48 = vld [vmem:[#allocation7 + $0x628] sm:$0xff] }
 0x11f   : > { %1166 = vmatpush2.msra.mxu1 %v472_v49  ;;  %1205 = vmatpush1.msra.mxu0 %v616_v50  ;;  %v609_v49 = vld [vmem:[#allocation7 + $0xaf0] sm:$0xff]  ;;  %v312_v50 = vld [vmem:[#allocation7 + $0x1a8] sm:$0xff] }
 0x120   : > { %1167 = vmatprep.subr.mxu1 %v464_v51  ;;  %1206 = vmatprep.subr.mxu0 %v608_v52  ;;  %v447_v51 = vld [vmem:[#allocation7 + $0x5e0] sm:$0xff]  ;;  %v600_v52 = vld [vmem:[#allocation7 + $0xaa8] sm:$0xff] }
 0x121   : > { %1168 = vmatpush2.msra.mxu1 %v463_v53  ;;  %1207 = vmatpush1.msra.mxu0 %v607_v54  ;;  %v303_v53 = vld [vmem:[#allocation7 + $0x160] sm:$0xff]  ;;  %v438_v54 = vld [vmem:[#allocation7 + $0x598] sm:$0xff] }
 0x122   : > { %1169 = vmatprep.subr.mxu1 %v455_v55  ;;  %1208 = vmatprep.subr.mxu0 %v599_v56  ;;  %v591_v55 = vld [vmem:[#allocation7 + $0xa60] sm:$0xff]  ;;  %v294_v56 = vld [vmem:[#allocation7 + $0x118] sm:$0xff] }
 0x123   : > { %1170 = vmatpush2.msra.mxu1 %v454_v57  ;;  %1209 = vmatpush1.msra.mxu0 %v598_v58  ;;  %v429_v57 = vld [vmem:[#allocation7 + $0x550] sm:$0xff]  ;;  %v582_v58 = vld [vmem:[#allocation7 + $0xa18] sm:$0xff] }
 0x124   : > { %1171 = vmatprep.subr.mxu1 %v446_v59  ;;  %1210 = vmatprep.subr.mxu0 %v590_v60  ;;  %v285_v59 = vld [vmem:[#allocation7 + $0xd0] sm:$0xff]  ;;  %v420_v60 = vld [vmem:[#allocation7 + $0x508] sm:$0xff] }
 0x125   : > { %1172 = vmatpush2.msra.mxu1 %v445_v61  ;;  %1211 = vmatpush1.msra.mxu0 %v589_v62  ;;  %v276_v61 = vld [vmem:[#allocation7 + $0x88] sm:$0xff]  ;;  %v573_v62 = vld [vmem:[#allocation7 + $0x9d0] sm:$0xff] }
 0x126   : > { %1173 = vmatprep.subr.mxu1 %v437_v63  ;;  %1212 = vmatprep.subr.mxu0 %v581_v1  ;;  %v411_v63 = vld [vmem:[#allocation7 + $0x4c0] sm:$0xff] }
 0x127   : > { %1174 = vmatpush2.msra.mxu1 %v436_v2  ;;  %1213 = vmatpush1.msra.mxu0 %v580_v5  ;;  %v267_v1 = vld [vmem:[#allocation7 + $0x40] sm:$0xff]  ;;  %v564_v2 = vld [vmem:[#allocation7 + $0x988] sm:$0xff] }
 0x128   : > { %1175 = vmatprep.subr.mxu1 %v428_v7  ;;  %1214 = vmatprep.subr.mxu0 %v572_v8  ;;  %v555_v5 = vld [vmem:[#allocation7 + $0x940] sm:$0xff] }
 0x129   : > { %1176 = vmatpush2.msra.mxu1 %v427_v9  ;;  %1215 = vmatpush1.msra.mxu0 %v571_v10 }
 0x12a   : > { %1177 = vmatprep.subr.mxu1 %v419_v11  ;;  %1216 = vmatprep.subr.mxu0 %v563_v12 }
 0x12b   : > { %1178 = vmatpush2.msra.mxu1 %v418_v13  ;;  %1217 = vmatpush1.msra.mxu0 %v562_v14 }
 0x12c   : > { %1179 = vmatprep.subr.mxu1 %v410_v15  ;;  %1218 = vmatprep.subr.mxu0 %v554_v16 }
 0x12d   : > { %1180 = vmatpush2.msra.mxu1 %v409_v17  ;;  %1181 = vmatprep.mubr.f32.mxu1 %v4502_v20 }
 0x12e   : > { %1219 = vmatpush1.msra.mxu0 %v553_v18  ;;  %1252 = vmatprep.mubr.f32.mxu0 %v4305_v0 }
 0x12f   : > { %1182 = vmatmul.mubr.f32.vlgmr.msra.gmra.mxu1 %v4507_v22  ;;  %1253 = vmatmul.mubr.f32.vlgmr.msra.gmra.mxu0 %v4511_v25 }
 0x130   : > { %3663 = vmatprep.subr.mxu0 %v546_v19  ;;  %3793 = vmatprep.subr.mxu1 %v4305_v0 }
 0x131   : > { %3664 = vmatpush3.msra.mxu0 %v402_v21  ;;  %3794 = vmatpush3.msra.mxu1 %v690_v24 }
 0x132   : > { %3665 = vmatprep.subr.mxu0 %v537_v23  ;;  %3795 = vmatprep.subr.mxu1 %v4305_v0 }
 0x133   : > { %3666 = vmatpush3.msra.mxu0 %v393_v26  ;;  %3796 = vmatpush3.msra.mxu1 %v681_v28 }
 0x134   : > { %3667 = vmatprep.subr.mxu0 %v528_v27  ;;  %3797 = vmatprep.subr.mxu1 %v4305_v0 }
 0x135   : > { %3668 = vmatpush3.msra.mxu0 %v384_v29  ;;  %3798 = vmatpush3.msra.mxu1 %v672_v30 }
 0x136   : > { %3669 = vmatprep.subr.mxu0 %v519_v4  ;;  %3799 = vmatprep.subr.mxu1 %v4305_v0 }
 0x137   : > { %3670 = vmatpush3.msra.mxu0 %v375_v31  ;;  %3800 = vmatpush3.msra.mxu1 %v663_v3 }
 0x138   : > { %3671 = vmatprep.subr.mxu0 %v510_v6  ;;  %3801 = vmatprep.subr.mxu1 %v4305_v0 }
 0x139   : > { %3672 = vmatpush3.msra.mxu0 %v366_v32  ;;  %3802 = vmatpush3.msra.mxu1 %v654_v34  ;;  %v1408_v34 = vlaneseq }
 0x13a   : > { %3673 = vmatprep.subr.mxu0 %v501_v33  ;;  %3803 = vmatprep.subr.mxu1 %v4305_v0 }
 0x13b   : > { %3674 = vmatpush3.msra.mxu0 %v357_v35  ;;  %3804 = vmatpush3.msra.mxu1 %v645_v37  ;;  %v4560_v35 = vshrl.u32 %v1408_v34, 7  ;;  %v3151_v37 = vld [vmem:[#allocation9 + $0x468] sm:$0xff] }
 0x13c   : > { %3675 = vmatprep.subr.mxu0 %v492_v36  ;;  %3805 = vmatprep.subr.mxu1 %v4305_v0  ;;  %v1411_v36 = vand.u32 127, %v1408_v34 }
 0x13d   : > { %3676 = vmatpush3.msra.mxu0 %v348_v38  ;;  %3806 = vmatpush3.msra.mxu1 %v636_v40 }
 0x13e   : > { %3677 = vmatprep.subr.mxu0 %v483_v39  ;;  %3807 = vmatprep.subr.mxu1 %v4305_v0  ;;  %vm4563_vm2 = vcmp.le.s32.totalorder %v1411_v36, %v4560_v35  ;;  %v1772_v36 = vld [vmem:[#allocation9 + $0x170] sm:$0xff] }
 0x13f   : > { %3678 = vmatpush3.msra.mxu0 %v339_v41  ;;  %3808 = vmatpush3.msra.mxu1 %v627_v43 }
 0x140   : > { %3679 = vmatprep.subr.mxu0 %v474_v42  ;;  %3809 = vmatprep.subr.mxu1 %v4305_v0 }
 0x141   : > { %3680 = vmatpush3.msra.mxu0 %v330_v44  ;;  %3810 = vmatpush3.msra.mxu1 %v618_v46 }
 0x142   : > { %3681 = vmatprep.subr.mxu0 %v465_v45  ;;  %3811 = vmatprep.subr.mxu1 %v4305_v0 }
 0x143   : > { %3682 = vmatpush3.msra.mxu0 %v321_v47  ;;  %3812 = vmatpush3.msra.mxu1 %v609_v49  ;;  %v1435_v47 = vld [vmem:[#allocation9 + $0xb0] sm:$0xff]  ;;  %v1436_v49 = vld [vmem:[#allocation9 + $0xb8] sm:$0xff] }
 0x144   : > { %3683 = vmatprep.subr.mxu0 %v456_v48  ;;  %3813 = vmatprep.subr.mxu1 %v4305_v0  ;;  %v1434_v48 = vld [vmem:[#allocation9 + $0xa8] sm:$0xff] }
 0x145   : > { %3684 = vmatpush3.msra.mxu0 %v312_v50  ;;  %3814 = vmatpush3.msra.mxu1 %v600_v52  ;;  %v1432_v50 = vld [vmem:[#allocation9 + $0x98] sm:$0xff]  ;;  %v1433_v52 = vld [vmem:[#allocation9 + $0xa0] sm:$0xff] }
 0x146   : > { %3685 = vmatprep.subr.mxu0 %v447_v51  ;;  %3815 = vmatprep.subr.mxu1 %v4305_v0  ;;  %v1431_v51 = vld [vmem:[#allocation9 + $0x90] sm:$0xff] }
 0x147   : > { %3686 = vmatpush3.msra.mxu0 %v303_v53  ;;  %3816 = vmatpush3.msra.mxu1 %v591_v55  ;;  %v1429_v53 = vld [vmem:[#allocation9 + $0x80] sm:$0xff]  ;;  %v1428_v55 = vld [vmem:[#allocation9 + $0x78] sm:$0xff] }
 0x148   : > { %3687 = vmatprep.subr.mxu0 %v438_v54  ;;  %3817 = vmatprep.subr.mxu1 %v4305_v0  ;;  %v1430_v54 = vld [vmem:[#allocation9 + $0x88] sm:$0xff] }
 0x149   : > { %3688 = vmatpush3.msra.mxu0 %v294_v56  ;;  %3818 = vmatpush3.msra.mxu1 %v582_v58  ;;  %v828_v7 = vpop.f32.mrf.mxu1  ;;  %v1426_v56 = vld [vmem:[#allocation9 + $0x68] sm:$0xff]  ;;  %v1425_v58 = vld [vmem:[#allocation9 + $0x60] sm:$0xff] }
 0x14a   : > { %3689 = vmatprep.subr.mxu0 %v429_v57  ;;  %3819 = vmatprep.subr.mxu1 %v4305_v0  ;;  %v1427_v57 = vld [vmem:[#allocation9 + $0x70] sm:$0xff] }
 0x14b   : > { %3690 = vmatpush3.msra.mxu0 %v285_v59  ;;  %1323 = vmatprep.mubr.f32.mxu0 %v4502_v20  ;;  %v830_v9 = vpop.f32.mrf.mxu1  ;;  %v1423_v59 = vld [vmem:[#allocation9 + $0x50] sm:$0xff] }
 0x14c   : > { %3691 = vmatprep.subr.mxu0 %v420_v60  ;;  %3820 = vmatpush3.msra.mxu1 %v573_v62  ;;  %v1424_v60 = vld [vmem:[#allocation9 + $0x58] sm:$0xff] }
 0x14d   : > { %3692 = vmatpush3.msra.mxu0 %v276_v61  ;;  %3821 = vmatprep.subr.mxu1 %v4305_v0  ;;  %v1422_v61 = vld [vmem:[#allocation9 + $0x48] sm:$0xff]  ;;  %v1420_v62 = vld [vmem:[#allocation9 + $0x38] sm:$0xff] }
 0x14e   : > { %3693 = vmatprep.subr.mxu0 %v411_v63  ;;  %3822 = vmatpush3.msra.mxu1 %v564_v2  ;;  %v1421_v63 = vld [vmem:[#allocation9 + $0x40] sm:$0xff] }
 0x14f   : > { %3694 = vmatpush3.msra.mxu0 %v267_v1  ;;  %3823 = vmatprep.subr.mxu1 %v4305_v0  ;;  %v1419_v1 = vld [vmem:[#allocation9 + $0x30] sm:$0xff]  ;;  %v1417_v2 = vld [vmem:[#allocation9 + $0x20] sm:$0xff] }
 0x150   : > { %1324 = vmatmul.mubr.f32.vlgmr.msra.gmra.mxu0 %v4507_v22  ;;  %3828 = vmatprep.subr.mxu0 %v4305_v0 }
 0x151   : > { %3825 = vmatprep.mubr.msk.f32.mxu1 %vm4306_vm0, %v4305_v0  ;;  %3824 = vmatpush3.msra.mxu1 %v555_v5  ;;  %v1418_v5 = vld [vmem:[#allocation9 + $0x28] sm:$0xff] }
 0x152   : > { %3830 = vmatprep.mubr.msk.f32.mxu0 %vm4306_vm0, %v4305_v0  ;;  %3826 = vmatmul.mubr.f32.vlgmr.msra.gmra.mxu1 %v4511_v25 }
 0x153   : > { %3833 = vmatprep.subr.mxu1 %v4305_v0  ;;  %3835 = vmatprep.mubr.msk.f32.mxu1 %vm4306_vm0, %v4305_v0 }
 0x169   : > { %v757_v8 = vpop.f32.mrf.mxu0 }
 0x16a   : > { %v829_v18 = vadd.f32 %v828_v7, %v757_v8  ;;  %v1416_v7 = vld [vmem:[#allocation9 + $0x18] sm:$0xff]  ;;  %v1414_v8 = vld [vmem:[#allocation9 + $0x8] sm:$0xff] }
 0x16b   : > { %v759_v10 = vpop.f32.mrf.mxu0 }
 0x16c   : > { %v4541_v11 = vadd.f32 %v830_v9, %v759_v10  ;;  %v1413_v9 = vld [vmem:[#allocation9] sm:$0xff]  ;;  %v1415_v10 = vld [vmem:[#allocation9 + $0x10] sm:$0xff] }
 0x18b   : > { %v899_v12 = vpop.f32.mrf.mxu1  ;;  %v970_v13 = vpop.f32.mrf.mxu0 }
 0x18c   : > { %v4543_v14 = vadd.f32 %v970_v13, %v899_v12 }
 0x18d   : > { %v901_v15 = vpop.f32.mrf.mxu1  ;;  %v972_v16 = vpop.f32.mrf.mxu0 }
 0x18e   : > { %v973_v17 = vadd.f32 %v972_v16, %v901_v15 }
 0x190   : > { %1781 = vrot.lane.b32.xlu1 %v973_v17, %s4307_s21  ;;  %3829 = vmatpush3.xpose.msk.msra.mxu0 %vm1440_vm1, %v973_v17 }
 0x191   : > { %1622 = vmatprep.subr.mxu0 %v1435_v47  ;;  %v1764_v47 = vld [vmem:[#allocation9 + $0x130] sm:$0xff] }
 0x193   : > { %3831 = vmatmul.mubr.msk.f32.vlgmr.msra.gmra.mxu0 %vm1440_vm1, %v829_v18 }
 0x194   : > { %1778 = vrot.lane.b32.xlu1 %v829_v18, %s4307_s21  ;;  %1670 = vmatprep.mubr.f32.mxu0 %v4305_v0 }
 0x195   : > { %1623 = vmatpush1.msra.mxu0 %v1434_v48  ;;  %v1762_v48 = vld [vmem:[#allocation9 + $0x120] sm:$0xff] }
 0x196   : > { %1624 = vmatprep.subr.mxu0 %v1432_v50  ;;  %v1761_v50 = vld [vmem:[#allocation9 + $0x118] sm:$0xff] }
 0x197   : > { %1625 = vmatpush1.msra.mxu0 %v1431_v51  ;;  %v1759_v51 = vld [vmem:[#allocation9 + $0x108] sm:$0xff] }
 0x198   : > { %1626 = vmatprep.subr.mxu0 %v1429_v53  ;;  %v1758_v53 = vld [vmem:[#allocation9 + $0x100] sm:$0xff] }
 0x199   : > { %1627 = vmatpush1.msra.mxu0 %v1428_v55  ;;  %v1754_v55 = vld [vmem:[#allocation9 + $0xe0] sm:$0xff] }
 0x19a   : > { %1628 = vmatprep.subr.mxu0 %v1426_v56  ;;  %v1755_v56 = vld [vmem:[#allocation9 + $0xe8] sm:$0xff] }
 0x19b   : > { %1629 = vmatpush1.msra.mxu0 %v1425_v58  ;;  %v1751_v58 = vld [vmem:[#allocation9 + $0xc8] sm:$0xff] }
 0x19c   : > { %1630 = vmatprep.subr.mxu0 %v1423_v59  ;;  %v1750_v59 = vld [vmem:[#allocation9 + $0xc0] sm:$0xff] }
 0x19d   : > { %1631 = vmatpush1.msra.mxu0 %v1422_v61 }
 0x19e   : > { %1632 = vmatprep.subr.mxu0 %v1420_v62 }
 0x19f   : > { %1633 = vmatpush1.msra.mxu0 %v1419_v1 }
 0x1a0   : > { %1634 = vmatprep.subr.mxu0 %v1417_v2 }
 0x1a1   : > { %1635 = vmatpush1.msra.mxu0 %v1416_v7 }
 0x1a2   : > { %1636 = vmatprep.subr.mxu0 %v1414_v8 }
 0x1a3   : > { %1637 = vmatpush1.msra.mxu0 %v1413_v9 }
 0x1a4   : > { %3857 = vmatprep.subr.mxu0 %v4305_v0 }
 0x1ae   : > { %v1112_v19 = vpop.f32.mrf.mxu1 }
 0x1b0   : > { %v1114_v21 = vpop.f32.mrf.mxu1 }
 0x1cd   : > { %v1041_v20 = vpop.f32.mrf.mxu0 }
 0x1ce   : > { %v4550_v22 = vadd.f32 %v1112_v19, %v1041_v20 }
 0x1cf   : > { %v1043_v23 = vpop.f32.mrf.mxu0 }
 0x1d0   : > { %v4552_v24 = vadd.f32 %v1114_v21, %v1043_v23 }
 0x1ef   : > { %v1183_v25 = vpop.f32.mrf.mxu1  ;;  %v1254_v26 = vpop.f32.mrf.mxu0 }
 0x1f0   : > { %v1255_v27 = vadd.f32 %v1254_v26, %v1183_v25 }
 0x1f1   : > { %v1185_v28 = vpop.f32.mrf.mxu1  ;;  %v1256_v29 = vpop.f32.mrf.mxu0 }
 0x1f2   : > { %v4554_v4 = vadd.f32 %v1256_v29, %v1185_v28  ;;  %3834 = vmatpush3.msra.mxu1 %v1255_v27  ;;  %1869 = vrot.lane.b32.xlu1 %v1255_v27, %s4307_s21 }
 0x1f3   : > { %3838 = vmatprep.subr.mxu1 %v4305_v0 }
 0x202   : > { %v1782_v13 = vpop.permute.xlu1 %1781 }
 0x206   : > { %v1779_v15 = vpop.permute.xlu1 %1778 }
 0x210   : > { %v3695_v30 = vpop.f32.mrf.mxu0 }
 0x212   : > { %v3696_v31 = vpop.f32.mrf.mxu0  ;;  %v1395_v3 = vpop.f32.mrf.mxu1 }
 0x213   : > { %v3697_v6 = vadd.f32 %v3696_v31, %v3695_v30 }
 0x214   : > { %v3827_v33 = vpop.f32.mrf.mxu1 }
 0x215   : > { %v4558_v32 = vadd.f32 %v3697_v6, %v1395_v3 }
 0x253   : > { %v1513_v38 = vpop.f32.mrf.mxu0 }
 0x254   : > { %v1517_v39 = vsel %vm4563_vm2, %v1513_v38, -inf  ;;  %v1771_v38 = vld [vmem:[#allocation9 + $0x168] sm:$0xff] }
 0x255   : > { %v3832_v40 = vpop.f32.mrf.mxu0  ;;  %v1519_v41 = vsel %vm1518_vm3, %v1517_v39, -inf }
 0x256   : > { %1520 = vmax.xlane.f32.xlu0 %v1519_v41  ;;  %v1769_v40 = vld [vmem:[#allocation9 + $0x158] sm:$0xff]  ;;  %v1768_v41 = vld [vmem:[#allocation9 + $0x150] sm:$0xff] }
 0x264   : > { %v1870_v20 = vpop.permute.xlu1 %1869 }
 0x2df   : > { %v1521_v42 = vpop.xlane.xlu0 %1520 }
 0x2e0   : > { %v1522_v43 = vsub.f32 %v1517_v39, %v1521_v42  ;;  %v1773_v39 = vld [vmem:[#allocation9 + $0x178] sm:$0xff]  ;;  %v1770_v42 = vld [vmem:[#allocation9 + $0x160] sm:$0xff] }
 0x2e2   : > { %v1523_v44 = vmul.f32 1.442695, %v1522_v43  ;;  %v1766_v43 = vld [vmem:[#allocation9 + $0x140] sm:$0xff] }
 0x2e4   : > { %4090 = vpow2.f32 %v1523_v44  ;;  %v1767_v44 = vld [vmem:[#allocation9 + $0x148] sm:$0xff] }
 0x2f1   : > { %v4091_v45 = vpop.eup %4090 }
 0x2f2   : > { %3836 = vmatmul.mubr.msk.f32.vlgmr.msra.gmra.mxu1 %vm1518_vm3, %v4091_v45  ;;  %v1525_v46 = vsel %vm1518_vm3, %v4091_v45, 0.0  ;;  %v1765_v45 = vld [vmem:[#allocation9 + $0x138] sm:$0xff] }
 0x2f3   : > { %1526 = vadd.xlane.f32.xlu0 %v1525_v46  ;;  %3854 = vmatprep.mubr.msk.f32.mxu1 %vm4306_vm0, %v4305_v0  ;;  %v1763_v46 = vld [vmem:[#allocation9 + $0x128] sm:$0xff] }
 0x2f4   : > { %3839 = vmatpush3.msra.mxu1 %v1436_v49  ;;  %v1760_v49 = vld [vmem:[#allocation9 + $0x110] sm:$0xff] }
 0x2f5   : > { %3840 = vmatprep.subr.mxu1 %v4305_v0 }
 0x2f6   : > { %3841 = vmatpush3.msra.mxu1 %v1433_v52  ;;  %v1757_v52 = vld [vmem:[#allocation9 + $0xf8] sm:$0xff] }
 0x2f7   : > { %3842 = vmatprep.subr.mxu1 %v4305_v0 }
 0x2f8   : > { %3843 = vmatpush3.msra.mxu1 %v1430_v54  ;;  %v1756_v54 = vld [vmem:[#allocation9 + $0xf0] sm:$0xff] }
 0x2f9   : > { %3844 = vmatprep.subr.mxu1 %v4305_v0 }
 0x2fa   : > { %3845 = vmatpush3.msra.mxu1 %v1427_v57  ;;  %v1753_v57 = vld [vmem:[#allocation9 + $0xd8] sm:$0xff] }
 0x2fb   : > { %3846 = vmatprep.subr.mxu1 %v4305_v0 }
 0x2fc   : > { %3847 = vmatpush3.msra.mxu1 %v1424_v60  ;;  %v1752_v60 = vld [vmem:[#allocation9 + $0xd0] sm:$0xff] }
 0x2fd   : > { %3848 = vmatprep.subr.mxu1 %v4305_v0 }
 0x2fe   : > { %3849 = vmatpush3.msra.mxu1 %v1421_v63 }
 0x2ff   : > { %3850 = vmatprep.subr.mxu1 %v4305_v0 }
 0x300   : > { %3851 = vmatpush3.msra.mxu1 %v1418_v5 }
 0x301   : > { %3852 = vmatprep.subr.mxu1 %v4305_v0 }
 0x302   : > { %3853 = vmatpush3.msra.mxu1 %v1415_v10 }
 0x303   : > { %3862 = vmatprep.subr.mxu1 %v4305_v0 }
 0x37c   : > { %v1527_v12 = vpop.xlane.xlu0 %1526 }
 0x37d   : > { %4092 = vrcp.f32 %v1527_v12 }
 0x38a   : > { %v4093_v16 = vpop.eup %4092 }
 0x3b2   : > { %v1598_v17 = vpop.f32.mrf.mxu1 }
 0x3b3   : > { %v1602_v18 = vmul.f32 %v4093_v16, %v1598_v17 }
 0x3b4   : > { %v3837_v19 = vpop.f32.mrf.mxu1 }
 0x3b5   : > { %3633 = vmatmul.mubr.msk.f32.vlgmr.msra.gmra.mxu0 %vm1440_vm1, %v1602_v18  ;;  %3855 = vmatmul.mubr.msk.f32.vlgmr.msra.gmra.mxu1 %vm1440_vm1, %v1602_v18 }
 0x3b6   : > { %3858 = vmatpush3.xpose.msk.msra.mxu0 %vm1440_vm1, %v1782_v13  ;;  %3863 = vmatpush3.msra.mxu1 %v1870_v20 }
 0x3b7   : > { %3859 = vmatprep.mubr.msk.f32.mxu0 %vm4306_vm0, %v4305_v0  ;;  %3864 = vmatprep.mubr.msk.f32.mxu1 %vm4306_vm0, %v4305_v0 }
 0x3b8   : > { %3867 = vmatprep.subr.mxu1 %v4305_v0  ;;  %1965 = vmatprep.subr.mxu0 %v1772_v36  ;;  %v2113_v36 = vld [vmem:[#allocation9 + $0x1f0] sm:$0xff] }
 0x3b9   : > { %3860 = vmatmul.mubr.msk.f32.vlgmr.msra.gmra.mxu0 %vm1440_vm1, %v1779_v15 }
 0x3ba   : > { %2013 = vmatprep.mubr.f32.mxu0 %v4305_v0  ;;  %1966 = vmatpush1.msra.mxu0 %v1771_v38  ;;  %v2109_v38 = vld [vmem:[#allocation9 + $0x1d0] sm:$0xff] }
 0x3bb   : > { %1967 = vmatprep.subr.mxu0 %v1769_v40  ;;  %v2110_v40 = vld [vmem:[#allocation9 + $0x1d8] sm:$0xff] }
 0x3bc   : > { %1968 = vmatpush1.msra.mxu0 %v1768_v41  ;;  %v2106_v41 = vld [vmem:[#allocation9 + $0x1b8] sm:$0xff] }
 0x3bd   : > { %1969 = vmatprep.subr.mxu0 %v1766_v43  ;;  %v2103_v43 = vld [vmem:[#allocation9 + $0x1a0] sm:$0xff] }
 0x3be   : > { %1970 = vmatpush1.msra.mxu0 %v1765_v45  ;;  %v2104_v45 = vld [vmem:[#allocation9 + $0x1a8] sm:$0xff] }
 0x3bf   : > { %1971 = vmatprep.subr.mxu0 %v1763_v46  ;;  %v2099_v46 = vld [vmem:[#allocation9 + $0x180] sm:$0xff] }
 0x3c0   : > { %1972 = vmatpush1.msra.mxu0 %v1762_v48 }
 0x3c1   : > { %1973 = vmatprep.subr.mxu0 %v1760_v49 }
 0x3c2   : > { %1974 = vmatpush1.msra.mxu0 %v1759_v51 }
 0x3c3   : > { %1975 = vmatprep.subr.mxu0 %v1757_v52 }
 0x3c4   : > { %1976 = vmatpush1.msra.mxu0 %v1756_v54 }
 0x3c5   : > { %1977 = vmatprep.subr.mxu0 %v1754_v55 }
 0x3c6   : > { %1978 = vmatpush1.msra.mxu0 %v1753_v57 }
 0x3c7   : > { %1979 = vmatprep.subr.mxu0 %v1751_v58 }
 0x3c8   : > { %1980 = vmatpush1.msra.mxu0 %v1750_v59 }
 0x3c9   : > { %3886 = vmatprep.subr.mxu0 %v4305_v0 }
 0x475   : > { %v4593_v21 = vpop.f32.mrf.mxu0  ;;  %v4595_v23 = vpop.f32.mrf.mxu1 }
 0x477   : > { %v4597_v25 = vpop.f32.mrf.mxu0  ;;  %v3856_v26 = vpop.f32.mrf.mxu1 }
 0x478   : > { %v2121_v26 = vld [vmem:[#allocation9 + $0x230] sm:$0xff] }
 0x479   : > { %v1853_v27 = vpop.f32.mrf.mxu0 }
 0x47a   : > { %v1857_v28 = vsel %vm4563_vm2, %v1853_v27, -inf  ;;  %v2120_v27 = vld [vmem:[#allocation9 + $0x228] sm:$0xff] }
 0x47b   : > { %v3861_v29 = vpop.f32.mrf.mxu0  ;;  %v1858_v30 = vsel %vm1518_vm3, %v1857_v28, -inf }
 0x47c   : > { %1859 = vmax.xlane.f32.xlu0 %v1858_v30  ;;  %v2118_v29 = vld [vmem:[#allocation9 + $0x218] sm:$0xff]  ;;  %v2119_v30 = vld [vmem:[#allocation9 + $0x220] sm:$0xff] }
 0x505   : > { %v1860_v31 = vpop.xlane.xlu0 %1859 }
 0x506   : > { %v1861_v6 = vsub.f32 %v1857_v28, %v1860_v31  ;;  %v2122_v28 = vld [vmem:[#allocation9 + $0x238] sm:$0xff]  ;;  %v2115_v31 = vld [vmem:[#allocation9 + $0x200] sm:$0xff] }
 0x508   : > { %v1862_v3 = vmul.f32 1.442695, %v1861_v6  ;;  %v2114_v6 = vld [vmem:[#allocation9 + $0x1f8] sm:$0xff] }
 0x50a   : > { %4094 = vpow2.f32 %v1862_v3  ;;  %v2116_v3 = vld [vmem:[#allocation9 + $0x208] sm:$0xff] }
 0x517   : > { %v4095_v33 = vpop.eup %4094 }
 0x518   : > { %3865 = vmatmul.mubr.msk.f32.vlgmr.msra.gmra.mxu1 %vm1518_vm3, %v4095_v33  ;;  %v1864_v34 = vsel %vm1518_vm3, %v4095_v33, 0.0  ;;  %v2112_v33 = vld [vmem:[#allocation9 + $0x1e8] sm:$0xff] }
 0x519   : > { %1865 = vadd.xlane.f32.xlu0 %v1864_v34  ;;  %3883 = vmatprep.mubr.msk.f32.mxu1 %vm4306_vm0, %v4305_v0  ;;  %v2111_v34 = vld [vmem:[#allocation9 + $0x1e0] sm:$0xff] }
 0x51a   : > { %3868 = vmatpush3.msra.mxu1 %v1773_v39  ;;  %v2108_v39 = vld [vmem:[#allocation9 + $0x1c8] sm:$0xff] }
 0x51b   : > { %3869 = vmatprep.subr.mxu1 %v4305_v0 }
 0x51c   : > { %3870 = vmatpush3.msra.mxu1 %v1770_v42  ;;  %v2105_v42 = vld [vmem:[#allocation9 + $0x1b0] sm:$0xff] }
 0x51d   : > { %3871 = vmatprep.subr.mxu1 %v4305_v0 }
 0x51e   : > { %3872 = vmatpush3.msra.mxu1 %v1767_v44  ;;  %v2102_v44 = vld [vmem:[#allocation9 + $0x198] sm:$0xff] }
 0x51f   : > { %3873 = vmatprep.subr.mxu1 %v4305_v0 }
 0x520   : > { %3874 = vmatpush3.msra.mxu1 %v1764_v47  ;;  %v2101_v47 = vld [vmem:[#allocation9 + $0x190] sm:$0xff] }
 0x521   : > { %3875 = vmatprep.subr.mxu1 %v4305_v0 }
 0x522   : > { %3876 = vmatpush3.msra.mxu1 %v1761_v50 }
 0x523   : > { %3877 = vmatprep.subr.mxu1 %v4305_v0 }
 0x524   : > { %3878 = vmatpush3.msra.mxu1 %v1758_v53 }
 0x525   : > { %3879 = vmatprep.subr.mxu1 %v4305_v0 }
 0x526   : > { %3880 = vmatpush3.msra.mxu1 %v1755_v56 }
 0x527   : > { %3881 = vmatprep.subr.mxu1 %v4305_v0 }
 0x528   : > { %3882 = vmatpush3.msra.mxu1 %v1752_v60 }
 0x529   : > { %3891 = vmatprep.subr.mxu1 %v4305_v0 }
 0x5a2   : > { %v1866_v61 = vpop.xlane.xlu0 %1865 }
 0x5a3   : > { %4096 = vrcp.f32 %v1866_v61 }
 0x5b0   : > { %v4097_v62 = vpop.eup %4096 }
 0x5d8   : > { %v1941_v63 = vpop.f32.mrf.mxu1 }
 0x5d9   : > { %v1945_v1 = vmul.f32 %v4097_v62, %v1941_v63 }
 0x5da   : > { %v3866_v2 = vpop.f32.mrf.mxu1 }
 0x5db   : > { %3638 = vmatmul.mubr.msk.f32.vlgmr.msra.gmra.mxu0 %vm1440_vm1, %v1945_v1  ;;  %3884 = vmatmul.mubr.msk.f32.vlgmr.msra.gmra.mxu1 %vm1440_vm1, %v1945_v1 }
 0x5dc   : > { %3887 = vmatpush3.xpose.msk.msra.mxu0 %vm1440_vm1, %v4550_v22  ;;  %3892 = vmatpush3.msra.mxu1 %v4554_v4 }
 0x5dd   : > { %3888 = vmatprep.mubr.msk.f32.mxu0 %vm4306_vm0, %v4305_v0  ;;  %3893 = vmatprep.mubr.msk.f32.mxu1 %vm4306_vm0, %v4305_v0 }
 0x5de   : > { %3896 = vmatprep.subr.mxu1 %v4305_v0  ;;  %2306 = vmatprep.subr.mxu0 %v2121_v26  ;;  %v2455_v26 = vld [vmem:[#allocation9 + $0x2b8] sm:$0xff] }
 0x5df   : > { %3889 = vmatmul.mubr.msk.f32.vlgmr.msra.gmra.mxu0 %vm1440_vm1, %v4541_v11 }
 0x5e0   : > { %2354 = vmatprep.mubr.f32.mxu0 %v4305_v0  ;;  %2307 = vmatpush1.msra.mxu0 %v2120_v27  ;;  %v2457_v27 = vld [vmem:[#allocation9 + $0x2c8] sm:$0xff] }
 0x5e1   : > { %2308 = vmatprep.subr.mxu0 %v2118_v29  ;;  %v2452_v29 = vld [vmem:[#allocation9 + $0x2a0] sm:$0xff] }
 0x69b   : > { %v4628_v5 = vpop.f32.mrf.mxu0  ;;  %v4630_v7 = vpop.f32.mrf.mxu1 }
 0x69c   : > { %v2093_v56 = vadd.f32 %v4628_v5, %v4593_v21  ;;  %v2095_v57 = vadd.f32 %v4630_v7, %v4595_v23 }
 0x69d   : > { %v4632_v8 = vpop.f32.mrf.mxu0  ;;  %v3885_v9 = vpop.f32.mrf.mxu1 }
 0x69e   : > { %v2094_v60 = vadd.f32 %v4632_v8, %v4597_v25 }
 0x69f   : > { %v2198_v10 = vpop.f32.mrf.mxu0 }
 0x6a0   : > { %v2202_v12 = vsel %vm4563_vm2, %v2198_v10, -inf }
 0x6a1   : > { %v3890_v13 = vpop.f32.mrf.mxu0  ;;  %v2203_v15 = vsel %vm1518_vm3, %v2202_v12, -inf }
 0x6a2   : > { %2204 = vmax.xlane.f32.xlu1 %v2203_v15  ;;  %v2462_v13 = vld [vmem:[#allocation9 + $0x2f0] sm:$0xff]  ;;  %v2461_v15 = vld [vmem:[#allocation9 + $0x2e8] sm:$0xff] }
 0x6b3   : > { %2559 = vrot.lane.b32.xlu1 %v4554_v4, %s4307_s21  ;;  %v2117_v4 = vld [vmem:[#allocation9 + $0x210] sm:$0xff] }
 0x6b4   : > { %2309 = vmatpush1.msra.mxu0 %v2117_v4  ;;  %v2454_v4 = vld [vmem:[#allocation9 + $0x2b0] sm:$0xff] }
 0x6b5   : > { %2310 = vmatprep.subr.mxu0 %v2115_v31  ;;  %v2449_v31 = vld [vmem:[#allocation9 + $0x288] sm:$0xff] }
 0x6b6   : > { %2311 = vmatpush1.msra.mxu0 %v2114_v6  ;;  %v2451_v6 = vld [vmem:[#allocation9 + $0x298] sm:$0xff] }
 0x6b7   : > { %2312 = vmatprep.subr.mxu0 %v2112_v33  ;;  %v2446_v33 = vld [vmem:[#allocation9 + $0x270] sm:$0xff] }
 0x6b8   : > { %2313 = vmatpush1.msra.mxu0 %v2111_v34  ;;  %v2448_v34 = vld [vmem:[#allocation9 + $0x280] sm:$0xff] }
 0x6b9   : > { %2314 = vmatprep.subr.mxu0 %v2109_v38  ;;  %v2443_v38 = vld [vmem:[#allocation9 + $0x258] sm:$0xff] }
 0x6ba   : > { %2315 = vmatpush1.msra.mxu0 %v2108_v39  ;;  %v2445_v39 = vld [vmem:[#allocation9 + $0x268] sm:$0xff] }
 0x6bb   : > { %2316 = vmatprep.subr.mxu0 %v2106_v41  ;;  %v2440_v41 = vld [vmem:[#allocation9 + $0x240] sm:$0xff] }
 0x6bc   : > { %2317 = vmatpush1.msra.mxu0 %v2105_v42  ;;  %v2442_v42 = vld [vmem:[#allocation9 + $0x250] sm:$0xff] }
 0x6bd   : > { %2318 = vmatprep.subr.mxu0 %v2103_v43 }
 0x6be   : > { %2319 = vmatpush1.msra.mxu0 %v2102_v44 }
 0x72b   : > { %v2205_v16 = vpop.xlane.xlu1 %2204 }
 0x72c   : > { %v2206_v17 = vsub.f32 %v2202_v12, %v2205_v16  ;;  %v2463_v16 = vld [vmem:[#allocation9 + $0x2f8] sm:$0xff] }
 0x72e   : > { %v2207_v18 = vmul.f32 1.442695, %v2206_v17  ;;  %v2459_v17 = vld [vmem:[#allocation9 + $0x2d8] sm:$0xff] }
 0x72f   : > { %v2560_v54 = vpop.permute.xlu1 %2559 }
 0x730   : > { %4098 = vpow2.f32 %v2207_v18  ;;  %v2458_v18 = vld [vmem:[#allocation9 + $0x2d0] sm:$0xff] }
 0x73d   : > { %v4099_v19 = vpop.eup %4098 }
 0x73e   : > { %3894 = vmatmul.mubr.msk.f32.vlgmr.msra.gmra.mxu1 %vm1518_vm3, %v4099_v19  ;;  %v2209_v20 = vsel %vm1518_vm3, %v4099_v19, 0.0  ;;  %v2460_v19 = vld [vmem:[#allocation9 + $0x2e0] sm:$0xff] }
 0x73f   : > { %2210 = vadd.xlane.f32.xlu0 %v2209_v20  ;;  %3912 = vmatprep.mubr.msk.f32.mxu1 %vm4306_vm0, %v4305_v0  ;;  %v2456_v20 = vld [vmem:[#allocation9 + $0x2c0] sm:$0xff] }
 0x740   : > { %3897 = vmatpush3.msra.mxu1 %v2122_v28  ;;  %v2453_v28 = vld [vmem:[#allocation9 + $0x2a8] sm:$0xff] }
 0x741   : > { %3898 = vmatprep.subr.mxu1 %v4305_v0 }
 0x742   : > { %3899 = vmatpush3.msra.mxu1 %v2119_v30  ;;  %v2450_v30 = vld [vmem:[#allocation9 + $0x290] sm:$0xff] }
 0x743   : > { %3900 = vmatprep.subr.mxu1 %v4305_v0 }
 0x744   : > { %3901 = vmatpush3.msra.mxu1 %v2116_v3  ;;  %v2447_v3 = vld [vmem:[#allocation9 + $0x278] sm:$0xff] }
 0x745   : > { %3902 = vmatprep.subr.mxu1 %v4305_v0 }
 0x746   : > { %3903 = vmatpush3.msra.mxu1 %v2113_v36  ;;  %v2444_v36 = vld [vmem:[#allocation9 + $0x260] sm:$0xff] }
 0x747   : > { %3904 = vmatprep.subr.mxu1 %v4305_v0 }
 0x748   : > { %3905 = vmatpush3.msra.mxu1 %v2110_v40  ;;  %v2441_v40 = vld [vmem:[#allocation9 + $0x248] sm:$0xff] }
 0x749   : > { %3906 = vmatprep.subr.mxu1 %v4305_v0 }
 0x755   : > { %2471 = vrot.lane.b32.xlu0 %v4550_v22, %s4307_s21  ;;  %v2107_v22 = vld [vmem:[#allocation9 + $0x1c0] sm:$0xff] }
 0x756   : > { %3907 = vmatpush3.msra.mxu1 %v2107_v22 }
 0x757   : > { %3908 = vmatprep.subr.mxu1 %v4305_v0 }
 0x758   : > { %3909 = vmatpush3.msra.mxu1 %v2104_v45 }
 0x759   : > { %2468 = vrot.lane.b32.xlu0 %v4541_v11, %s4307_s21  ;;  %3910 = vmatprep.subr.mxu1 %v4305_v0  ;;  %v2100_v11 = vld [vmem:[#allocation9 + $0x188] sm:$0xff] }
 0x75a   : > { %2320 = vmatprep.subr.mxu0 %v2100_v11  ;;  %3911 = vmatpush3.msra.mxu1 %v2101_v47 }
 0x75b   : > { %2321 = vmatpush1.msra.mxu0 %v2099_v46  ;;  %3920 = vmatprep.subr.mxu1 %v4305_v0 }
 0x75c   : > { %3915 = vmatprep.subr.mxu0 %v4305_v0 }
 0x7c8   : > { %v2211_v48 = vpop.xlane.xlu0 %2210 }
 0x7c9   : > { %4100 = vrcp.f32 %v2211_v48 }
 0x7cc   : > { %v2472_v50 = vpop.permute.xlu0 %2471 }
 0x7d0   : > { %v2469_v55 = vpop.permute.xlu0 %2468 }
 0x7d6   : > { %v4101_v49 = vpop.eup %4100 }
 0x7fe   : > { %v2282_v51 = vpop.f32.mrf.mxu1 }
 0x7ff   : > { %v2286_v52 = vmul.f32 %v4101_v49, %v2282_v51 }
 0x800   : > { %v3895_v53 = vpop.f32.mrf.mxu1 }
 0x801   : > { %3643 = vmatmul.mubr.msk.f32.vlgmr.msra.gmra.mxu0 %vm1440_vm1, %v2286_v52  ;;  %3913 = vmatmul.mubr.msk.f32.vlgmr.msra.gmra.mxu1 %vm1440_vm1, %v2286_v52 }
 0x802   : > { %3916 = vmatpush3.xpose.msk.msra.mxu0 %vm1440_vm1, %v2472_v50  ;;  %3921 = vmatpush3.msra.mxu1 %v2560_v54 }
 0x803   : > { %3917 = vmatprep.mubr.msk.f32.mxu0 %vm4306_vm0, %v4305_v0  ;;  %3922 = vmatprep.mubr.msk.f32.mxu1 %vm4306_vm0, %v4305_v0 }
 0x804   : > { %3925 = vmatprep.subr.mxu1 %v4305_v0  ;;  %2655 = vmatprep.subr.mxu0 %v2462_v13  ;;  %v2796_v13 = vld [vmem:[#allocation9 + $0x338] sm:$0xff] }
 0x805   : > { %3918 = vmatmul.mubr.msk.f32.vlgmr.msra.gmra.mxu0 %vm1440_vm1, %v2469_v55 }
 0x806   : > { %2703 = vmatprep.mubr.f32.mxu0 %v4305_v0  ;;  %2656 = vmatpush1.msra.mxu0 %v2461_v15  ;;  %v2795_v15 = vld [vmem:[#allocation9 + $0x330] sm:$0xff] }
 0x807   : > { %2657 = vmatprep.subr.mxu0 %v2459_v17  ;;  %v2793_v17 = vld [vmem:[#allocation9 + $0x320] sm:$0xff] }
 0x808   : > { %2658 = vmatpush1.msra.mxu0 %v2458_v18  ;;  %v2792_v18 = vld [vmem:[#allocation9 + $0x318] sm:$0xff] }
 0x809   : > { %2659 = vmatprep.subr.mxu0 %v2456_v20  ;;  %v2789_v20 = vld [vmem:[#allocation9 + $0x300] sm:$0xff] }
 0x80a   : > { %2660 = vmatpush1.msra.mxu0 %v2455_v26  ;;  %v2791_v26 = vld [vmem:[#allocation9 + $0x310] sm:$0xff] }
 0x80b   : > { %2661 = vmatprep.subr.mxu0 %v2453_v28 }
 0x80c   : > { %2662 = vmatpush1.msra.mxu0 %v2452_v29 }
 0x80d   : > { %2663 = vmatprep.subr.mxu0 %v2450_v30 }
 0x80e   : > { %2664 = vmatpush1.msra.mxu0 %v2449_v31 }
 0x80f   : > { %2665 = vmatprep.subr.mxu0 %v2447_v3 }
 0x810   : > { %2666 = vmatpush1.msra.mxu0 %v2446_v33 }
 0x811   : > { %2667 = vmatprep.subr.mxu0 %v2444_v36 }
 0x812   : > { %2668 = vmatpush1.msra.mxu0 %v2443_v38 }
 0x813   : > { %2669 = vmatprep.subr.mxu0 %v2441_v40 }
 0x814   : > { %2670 = vmatpush1.msra.mxu0 %v2440_v41 }
 0x815   : > { %3944 = vmatprep.subr.mxu0 %v4305_v0 }
 0x8c1   : > { %v2356_v58 = vpop.f32.mrf.mxu0  ;;  %v2427_v59 = vpop.f32.mrf.mxu1 }
 0x8c2   : > { %v4672_v61 = vadd.f32 %v2356_v58, %v2093_v56  ;;  %v4674_v62 = vadd.f32 %v2427_v59, %v2095_v57 }
 0x8c3   : > { %v2358_v63 = vpop.f32.mrf.mxu0  ;;  %v3914_v1 = vpop.f32.mrf.mxu1 }
 0x8c4   : > { %v4676_v2 = vadd.f32 %v2358_v63, %v2094_v60  ;;  %v2811_v60 = vld [vmem:[#allocation9 + $0x3b0] sm:$0xff]  ;;  %v2808_v63 = vld [vmem:[#allocation9 + $0x398] sm:$0xff] }
 0x8c5   : > { %v2543_v9 = vpop.f32.mrf.mxu0  ;;  %v2807_v1 = vld [vmem:[#allocation9 + $0x390] sm:$0xff] }
 0x8c6   : > { %v2547_v21 = vsel %vm4563_vm2, %v2543_v9, -inf  ;;  %v2805_v9 = vld [vmem:[#allocation9 + $0x380] sm:$0xff] }
 0x8c7   : > { %v3919_v5 = vpop.f32.mrf.mxu0  ;;  %v2548_v23 = vsel %vm1518_vm3, %v2547_v21, -inf }
 0x8c8   : > { %2549 = vmax.xlane.f32.xlu0 %v2548_v23  ;;  %v2804_v5 = vld [vmem:[#allocation9 + $0x378] sm:$0xff]  ;;  %v2802_v23 = vld [vmem:[#allocation9 + $0x368] sm:$0xff] }
 0x951   : > { %v2550_v7 = vpop.xlane.xlu0 %2549 }
 0x952   : > { %v2551_v10 = vsub.f32 %v2547_v21, %v2550_v7  ;;  %v2806_v21 = vld [vmem:[#allocation9 + $0x388] sm:$0xff]  ;;  %v2803_v7 = vld [vmem:[#allocation9 + $0x370] sm:$0xff] }
 0x954   : > { %v2552_v12 = vmul.f32 1.442695, %v2551_v10  ;;  %v2801_v10 = vld [vmem:[#allocation9 + $0x360] sm:$0xff] }
 0x956   : > { %4102 = vpow2.f32 %v2552_v12  ;;  %v2799_v12 = vld [vmem:[#allocation9 + $0x350] sm:$0xff] }
 0x963   : > { %v4103_v25 = vpop.eup %4102 }
 0x964   : > { %3923 = vmatmul.mubr.msk.f32.vlgmr.msra.gmra.mxu1 %vm1518_vm3, %v4103_v25  ;;  %v2554_v8 = vsel %vm1518_vm3, %v4103_v25, 0.0  ;;  %v2798_v25 = vld [vmem:[#allocation9 + $0x348] sm:$0xff] }
 0x965   : > { %2555 = vadd.xlane.f32.xlu1 %v2554_v8  ;;  %3941 = vmatprep.mubr.msk.f32.mxu1 %vm4306_vm0, %v4305_v0  ;;  %v2800_v8 = vld [vmem:[#allocation9 + $0x358] sm:$0xff] }
 0x966   : > { %3926 = vmatpush3.msra.mxu1 %v2463_v16  ;;  %v2797_v16 = vld [vmem:[#allocation9 + $0x340] sm:$0xff] }
 0x967   : > { %3927 = vmatprep.subr.mxu1 %v4305_v0 }
 0x968   : > { %3928 = vmatpush3.msra.mxu1 %v2460_v19  ;;  %v2794_v19 = vld [vmem:[#allocation9 + $0x328] sm:$0xff] }
 0x969   : > { %3929 = vmatprep.subr.mxu1 %v4305_v0 }
 0x96a   : > { %3930 = vmatpush3.msra.mxu1 %v2457_v27 }
 0x96b   : > { %3931 = vmatprep.subr.mxu1 %v4305_v0 }
 0x96c   : > { %3932 = vmatpush3.msra.mxu1 %v2454_v4 }
 0x96d   : > { %3933 = vmatprep.subr.mxu1 %v4305_v0 }
 0x96e   : > { %3934 = vmatpush3.msra.mxu1 %v2451_v6 }
 0x96f   : > { %3935 = vmatprep.subr.mxu1 %v4305_v0 }
 0x970   : > { %3936 = vmatpush3.msra.mxu1 %v2448_v34 }
 0x971   : > { %3937 = vmatprep.subr.mxu1 %v4305_v0 }
 0x972   : > { %3938 = vmatpush3.msra.mxu1 %v2445_v39 }
 0x973   : > { %3939 = vmatprep.subr.mxu1 %v4305_v0 }
 0x974   : > { %3940 = vmatpush3.msra.mxu1 %v2442_v42 }
 0x975   : > { %3949 = vmatprep.subr.mxu1 %v4305_v0 }
 0x976   : > { %3158 = vrot.lane.b32.xlu1 %v4543_v14, %s4307_s21 }
 0x97a   : > { %3249 = vrot.lane.b32.xlu1 %v4558_v32, %s4307_s21 }
 0x9ee   : > { %v2556_v22 = vpop.xlane.xlu1 %2555 }
 0x9ef   : > { %4104 = vrcp.f32 %v2556_v22 }
 0x9f2   : > { %v3159_v28 = vpop.permute.xlu1 %3158 }
 0x9f6   : > { %v3250_v6 = vpop.permute.xlu1 %3249 }
 0x9fc   : > { %v4105_v43 = vpop.eup %4104 }
 0xa24   : > { %v2631_v44 = vpop.f32.mrf.mxu1 }
 0xa25   : > { %v2635_v45 = vmul.f32 %v4105_v43, %v2631_v44 }
 0xa26   : > { %v3924_v11 = vpop.f32.mrf.mxu1 }
 0xa27   : > { %3648 = vmatmul.mubr.msk.f32.vlgmr.msra.gmra.mxu0 %vm1440_vm1, %v2635_v45  ;;  %3942 = vmatmul.mubr.msk.f32.vlgmr.msra.gmra.mxu1 %vm1440_vm1, %v2635_v45 }
 0xa28   : > { %3945 = vmatpush3.xpose.msk.msra.mxu0 %vm1440_vm1, %v4552_v24  ;;  %3950 = vmatpush3.msra.mxu1 %v4558_v32 }
 0xa29   : > { %3946 = vmatprep.mubr.msk.f32.mxu0 %vm4306_vm0, %v4305_v0  ;;  %3951 = vmatprep.mubr.msk.f32.mxu1 %vm4306_vm0, %v4305_v0 }
 0xa2a   : > { %3954 = vmatprep.subr.mxu1 %v4305_v0  ;;  %2996 = vmatprep.subr.mxu0 %v2811_v60  ;;  %v3139_v60 = vld [vmem:[#allocation9 + $0x408] sm:$0xff] }
 0xa2b   : > { %3947 = vmatmul.mubr.msk.f32.vlgmr.msra.gmra.mxu0 %vm1440_vm1, %v4543_v14 }
 0xa2c   : > { %3044 = vmatprep.mubr.f32.mxu0 %v4305_v0 }
 0xae7   : > { %v2705_v46 = vpop.f32.mrf.mxu0  ;;  %v2776_v47 = vpop.f32.mrf.mxu1 }
 0xae8   : > { %v4712_v48 = vadd.f32 %v2705_v46, %v4672_v61  ;;  %v4715_v32 = vadd.f32 %v2776_v47, %v4674_v62  ;;  %v2810_v61 = vld [vmem:[#allocation9 + $0x3a8] sm:$0xff]  ;;  %v2812_v62 = vld [vmem:[#allocation9 + $0x3b8] sm:$0xff] }
 0xae9   : > { %v2707_v49 = vpop.f32.mrf.mxu0  ;;  %v3943_v50 = vpop.f32.mrf.mxu1  ;;  %2997 = vmatpush1.msra.mxu0 %v2810_v61  ;;  %v3137_v61 = vld [vmem:[#allocation9 + $0x3f8] sm:$0xff] }
 0xaea   : > { %v4718_v51 = vadd.f32 %v2707_v49, %v4676_v2  ;;  %v2809_v2 = vld [vmem:[#allocation9 + $0x3a0] sm:$0xff]  ;;  %2998 = vmatprep.subr.mxu0 %v2808_v63  ;;  %v3153_v49 = vld [vmem:[#allocation9 + $0x478] sm:$0xff]  ;;  %v3136_v63 = vld [vmem:[#allocation9 + $0x3f0] sm:$0xff] }
 0xaeb   : > { %v2888_v52 = vpop.f32.mrf.mxu0  ;;  %2999 = vmatpush1.msra.mxu0 %v2807_v1  ;;  %v3149_v50 = vld [vmem:[#allocation9 + $0x458] sm:$0xff]  ;;  %v3134_v1 = vld [vmem:[#allocation9 + $0x3e0] sm:$0xff] }
 0xaec   : > { %v2892_v53 = vsel %vm4563_vm2, %v2888_v52, -inf  ;;  %3000 = vmatprep.subr.mxu0 %v2805_v9  ;;  %v3150_v52 = vld [vmem:[#allocation9 + $0x460] sm:$0xff]  ;;  %v3135_v9 = vld [vmem:[#allocation9 + $0x3e8] sm:$0xff] }
 0xaed   : > { %v3948_v14 = vpop.f32.mrf.mxu0  ;;  %v2893_v54 = vsel %vm1518_vm3, %v2892_v53, -inf  ;;  %3001 = vmatpush1.msra.mxu0 %v2804_v5  ;;  %v3130_v5 = vld [vmem:[#allocation9 + $0x3c0] sm:$0xff] }
 0xaee   : > { %2894 = vmax.xlane.f32.xlu0 %v2893_v54  ;;  %3002 = vmatprep.subr.mxu0 %v2802_v23  ;;  %v3147_v14 = vld [vmem:[#allocation9 + $0x448] sm:$0xff]  ;;  %v3145_v54 = vld [vmem:[#allocation9 + $0x438] sm:$0xff]  ;;  %v3132_v23 = vld [vmem:[#allocation9 + $0x3d0] sm:$0xff] }
 0xaef   : > { %3003 = vmatpush1.msra.mxu0 %v2801_v10 }
 0xaf0   : > { %3004 = vmatprep.subr.mxu0 %v2799_v12 }
 0xaf1   : > { %3005 = vmatpush1.msra.mxu0 %v2798_v25 }
 0xaf2   : > { %3006 = vmatprep.subr.mxu0 %v2796_v13  ;;  %v3486_v13 = vsub.s32 0, %v4560_v35 }
 0xaf3   : > { %3007 = vmatpush1.msra.mxu0 %v2795_v15  ;;  %v3482_v15 = vld [vmem:[#allocation10] sm:$0x7] }
 0xaf4   : > { %3008 = vmatprep.subr.mxu0 %v2793_v17  ;;  %v3487_v17 = vrot.slane %v3482_v15, %v3486_v13 }
 0xaf5   : > { %3009 = vmatpush1.msra.mxu0 %v2792_v18 }
 0xb77   : > { %v2895_v55 = vpop.xlane.xlu0 %2894 }
 0xb78   : > { %v2896_v56 = vsub.f32 %v2892_v53, %v2895_v55  ;;  %v3146_v53 = vld [vmem:[#allocation9 + $0x440] sm:$0xff]  ;;  %v3143_v55 = vld [vmem:[#allocation9 + $0x428] sm:$0xff] }
 0xb7a   : > { %v2897_v57 = vmul.f32 1.442695, %v2896_v56  ;;  %v3144_v56 = vld [vmem:[#allocation9 + $0x430] sm:$0xff] }
 0xb7c   : > { %4106 = vpow2.f32 %v2897_v57  ;;  %v3142_v57 = vld [vmem:[#allocation9 + $0x420] sm:$0xff] }
 0xb89   : > { %v4107_v58 = vpop.eup %4106 }
 0xb8a   : > { %3952 = vmatmul.mubr.msk.f32.vlgmr.msra.gmra.mxu1 %vm1518_vm3, %v4107_v58  ;;  %v2899_v59 = vsel %vm1518_vm3, %v4107_v58, 0.0  ;;  %v3140_v58 = vld [vmem:[#allocation9 + $0x410] sm:$0xff] }
 0xb8b   : > { %2900 = vadd.xlane.f32.xlu0 %v2899_v59  ;;  %3970 = vmatprep.mubr.msk.f32.mxu1 %vm4306_vm0, %v4305_v0  ;;  %v3141_v59 = vld [vmem:[#allocation9 + $0x418] sm:$0xff] }
 0xb8c   : > { %3955 = vmatpush3.msra.mxu1 %v2812_v62  ;;  %v3138_v62 = vld [vmem:[#allocation9 + $0x400] sm:$0xff] }
 0xb8d   : > { %3956 = vmatprep.subr.mxu1 %v4305_v0 }
 0xb8e   : > { %3957 = vmatpush3.msra.mxu1 %v2809_v2  ;;  %v3133_v2 = vld [vmem:[#allocation9 + $0x3d8] sm:$0xff] }
 0xb8f   : > { %3958 = vmatprep.subr.mxu1 %v4305_v0 }
 0xb90   : > { %3959 = vmatpush3.msra.mxu1 %v2806_v21  ;;  %v3131_v21 = vld [vmem:[#allocation9 + $0x3c8] sm:$0xff] }
 0xb91   : > { %3960 = vmatprep.subr.mxu1 %v4305_v0 }
 0xb92   : > { %3961 = vmatpush3.msra.mxu1 %v2803_v7 }
 0xb93   : > { %3962 = vmatprep.subr.mxu1 %v4305_v0 }
 0xb94   : > { %3963 = vmatpush3.msra.mxu1 %v2800_v8 }
 0xb95   : > { %3964 = vmatprep.subr.mxu1 %v4305_v0 }
 0xb96   : > { %3965 = vmatpush3.msra.mxu1 %v2797_v16  ;;  %v3490_v16 = vsub.s32 1, %v4560_v35 }
 0xb97   : > { %3966 = vmatprep.subr.mxu1 %v4305_v0 }
 0xb98   : > { %3967 = vmatpush3.msra.mxu1 %v2794_v19 }
 0xb99   : > { %3968 = vmatprep.subr.mxu1 %v4305_v0 }
 0xb9a   : > { %3969 = vmatpush3.msra.mxu1 %v2791_v26 }
 0xb9b   : > { %3978 = vmatprep.subr.mxu1 %v4305_v0 }
 0xba1   : > { %3161 = vrot.lane.b32.xlu0 %v4552_v24, %s4307_s21  ;;  %v2790_v24 = vld [vmem:[#allocation9 + $0x308] sm:$0xff] }
 0xba2   : > { %3010 = vmatprep.subr.mxu0 %v2790_v24 }
 0xba3   : > { %3011 = vmatpush1.msra.mxu0 %v2789_v20 }
 0xba4   : > { %3973 = vmatprep.subr.mxu0 %v4305_v0 }
 0xc14   : > { %v2901_v27 = vpop.xlane.xlu0 %2900 }
 0xc15   : > { %4108 = vrcp.f32 %v2901_v27  ;;  %v3491_v27 = vrot.slane %v3482_v15, %v3490_v16 }
 0xc18   : > { %v3162_v3 = vpop.permute.xlu0 %3161 }
 0xc22   : > { %v4109_v29 = vpop.eup %4108 }
 0xc4a   : > { %v2972_v4 = vpop.f32.mrf.mxu1 }
 0xc4b   : > { %v2976_v30 = vmul.f32 %v4109_v29, %v2972_v4 }
 0xc4c   : > { %v3953_v31 = vpop.f32.mrf.mxu1 }
 0xc4d   : > { %3653 = vmatmul.mubr.msk.f32.vlgmr.msra.gmra.mxu0 %vm1440_vm1, %v2976_v30  ;;  %3971 = vmatmul.mubr.msk.f32.vlgmr.msra.gmra.mxu1 %vm1440_vm1, %v2976_v30 }
 0xc4e   : > { %3974 = vmatpush3.xpose.msk.msra.mxu0 %vm1440_vm1, %v3162_v3  ;;  %3979 = vmatpush3.msra.mxu1 %v3250_v6 }
 0xc4f   : > { %3975 = vmatprep.mubr.msk.f32.mxu0 %vm4306_vm0, %v4305_v0  ;;  %3980 = vmatprep.mubr.msk.f32.mxu1 %vm4306_vm0, %v4305_v0 }
 0xc50   : > { %3983 = vmatprep.subr.mxu1 %v4305_v0 }
 0xc51   : > { %3976 = vmatmul.mubr.msk.f32.vlgmr.msra.gmra.mxu0 %vm1440_vm1, %v3159_v28 }
 0xc52   : > { %3393 = vmatprep.mubr.f32.mxu0 %v4305_v0 }
 0xd0d   : > { %v3046_v33 = vpop.f32.mrf.mxu0  ;;  %v3117_v34 = vpop.f32.mrf.mxu1 }
 0xd0e   : > { %v4749_v36 = vadd.f32 %v3046_v33, %v4712_v48  ;;  %v4752_v38 = vadd.f32 %v3117_v34, %v4715_v32  ;;  %v3152_v32 = vld [vmem:[#allocation9 + $0x470] sm:$0xff] }
 0xd0f   : > { %v3048_v39 = vpop.f32.mrf.mxu0  ;;  %v3972_v40 = vpop.f32.mrf.mxu1  ;;  %3345 = vmatprep.subr.mxu0 %v3152_v32 }
 0xd10   : > { %v4755_v41 = vadd.f32 %v3048_v39, %v4718_v51  ;;  %v3148_v51 = vld [vmem:[#allocation9 + $0x450] sm:$0xff]  ;;  %3346 = vmatpush1.msra.mxu0 %v3151_v37 }
 0xd11   : > { %v3233_v42 = vpop.f32.mrf.mxu0  ;;  %3347 = vmatprep.subr.mxu0 %v3149_v50 }
 0xd12   : > { %v3237_v22 = vsel %vm4563_vm2, %v3233_v42, -inf  ;;  %3348 = vmatpush1.msra.mxu0 %v3148_v51 }
 0xd13   : > { %v3977_v43 = vpop.f32.mrf.mxu0  ;;  %v3238_v44 = vsel %vm1518_vm3, %v3237_v22, -inf  ;;  %3349 = vmatprep.subr.mxu0 %v3146_v53 }
 0xd14   : > { %3239 = vmax.xlane.f32.xlu0 %v3238_v44  ;;  %3350 = vmatpush1.msra.mxu0 %v3145_v54 }
 0xd15   : > { %3351 = vmatprep.subr.mxu0 %v3143_v55 }
 0xd16   : > { %3352 = vmatpush1.msra.mxu0 %v3142_v57 }
 0xd17   : > { %3353 = vmatprep.subr.mxu0 %v3140_v58 }
 0xd18   : > { %3354 = vmatpush1.msra.mxu0 %v3139_v60 }
 0xd19   : > { %3355 = vmatprep.subr.mxu0 %v3137_v61 }
 0xd1a   : > { %3356 = vmatpush1.msra.mxu0 %v3136_v63 }
 0xd1b   : > { %3357 = vmatprep.subr.mxu0 %v3134_v1 }
 0xd1c   : > { %3358 = vmatpush1.msra.mxu0 %v3133_v2 }
 0xd1d   : > { %3359 = vmatprep.subr.mxu0 %v3131_v21 }
 0xd1e   : > { %3360 = vmatpush1.msra.mxu0 %v3130_v5 }
 0xd9d   : > { %v3240_v45 = vpop.xlane.xlu0 %3239 }
 0xd9e   : > { %v3241_v11 = vsub.f32 %v3237_v22, %v3240_v45 }
 0xda0   : > { %v3242_v46 = vmul.f32 1.442695, %v3241_v11 }
 0xda2   : > { %4110 = vpow2.f32 %v3242_v46 }
 0xdaf   : > { %v4111_v47 = vpop.eup %4110 }
 0xdb0   : > { %3981 = vmatmul.mubr.msk.f32.vlgmr.msra.gmra.mxu1 %vm1518_vm3, %v4111_v47  ;;  %v3244_v48 = vsel %vm1518_vm3, %v4111_v47, 0.0 }
 0xdb1   : > { %3245 = vadd.xlane.f32.xlu1 %v3244_v48  ;;  %3999 = vmatprep.mubr.msk.f32.mxu1 %vm4306_vm0, %v4305_v0 }
 0xdb2   : > { %3984 = vmatpush3.msra.mxu1 %v3153_v49 }
 0xdb3   : > { %3985 = vmatprep.subr.mxu1 %v4305_v0 }
 0xdb4   : > { %3986 = vmatpush3.msra.mxu1 %v3150_v52 }
 0xdb5   : > { %3987 = vmatprep.subr.mxu1 %v4305_v0 }
 0xdb6   : > { %3988 = vmatpush3.msra.mxu1 %v3147_v14 }
 0xdb7   : > { %3989 = vmatprep.subr.mxu1 %v4305_v0 }
 0xdb8   : > { %3990 = vmatpush3.msra.mxu1 %v3144_v56 }
 0xdb9   : > { %3991 = vmatprep.subr.mxu1 %v4305_v0 }
 0xdba   : > { %3992 = vmatpush3.msra.mxu1 %v3141_v59 }
 0xdbb   : > { %3993 = vmatprep.subr.mxu1 %v4305_v0 }
 0xdbc   : > { %3994 = vmatpush3.msra.mxu1 %v3138_v62 }
 0xdbd   : > { %3995 = vmatprep.subr.mxu1 %v4305_v0 }
 0xdbe   : > { %3996 = vmatpush3.msra.mxu1 %v3135_v9 }
 0xdbf   : > { %3997 = vmatprep.subr.mxu1 %v4305_v0  ;;  %v3494_v0 = vsub.s32 2, %v4560_v35 }
 0xdc0   : > { %3998 = vmatpush3.msra.mxu1 %v3132_v23 }
 0xdc1   : > { %v3495_v18 = vrot.slane %v3482_v15, %v3494_v0 }
 0xe3a   : > { %v3246_v7 = vpop.xlane.xlu1 %3245 }
 0xe3b   : > { %4112 = vrcp.f32 %v3246_v7 }
 0xe48   : > { %v4113_v10 = vpop.eup %4112 }
 0xe70   : > { %v3321_v12 = vpop.f32.mrf.mxu1 }
 0xe71   : > { %v3325_v25 = vmul.f32 %v4113_v10, %v3321_v12 }
 0xe72   : > { %v3982_v8 = vpop.f32.mrf.mxu1 }
 0xe73   : > { %3658 = vmatmul.mubr.msk.f32.vlgmr.msra.gmra.mxu0 %vm1440_vm1, %v3325_v25  ;;  %4000 = vmatmul.mubr.msk.f32.vlgmr.msra.gmra.mxu1 %vm1440_vm1, %v3325_v25 }
 0xf33   : > { %v3395_v19 = vpop.f32.mrf.mxu0  ;;  %v3466_v24 = vpop.f32.mrf.mxu1 }
 0xf34   : > { %v3473_v20 = vadd.f32 %v3395_v19, %v4749_v36  ;;  %v3475_v26 = vadd.f32 %v3466_v24, %v4752_v38 }
 0xf35   : > { %v3397_v28 = vpop.f32.mrf.mxu0  ;;  %v4001_v29 = vpop.f32.mrf.mxu1 }
 0xf36   : > { %v3499_v4 = vadd.f32 %v3487_v17, %v3473_v20  ;;  %v3501_v30 = vadd.f32 %v3495_v18, %v3475_v26  ;;  %v3474_v35 = vadd.f32 %v3397_v28, %v4755_v41 }
 0xf38   : > { %3502 = vst [vmem:[%s255_s9] sm:$0xff] %v3499_v4  ;;  %3504 = vst [vmem:[%s255_s9 + $0x10] sm:$0xff] %v3501_v30  ;;  %v3500_v31 = vadd.f32 %v3491_v27, %v3474_v35 }
 0xf3a   : > { %3503 = vst [vmem:[%s255_s9 + $0x8] sm:$0xff] %v3500_v31 }
 0xf3b   : > { %4236 = shalt.err (!%p4233_p9)
}
 0xf3c   : > { %s4237_s10 = scalar_lea.hbm %s3518_s29, 384  ;;  %s4241_s25 = scalar_lea.hbm %s4820_s4, 768 }
 0xf3d   : > { %p4238_p13 = scmp.ne.s32.totalorder %s3518_s29, %s4237_s10  ;;  %p4242_p6 = scmp.lt.s32.totalorder %s3518_s29, %s4820_s4 }
 0xf3e   : > { %p4243_p3 = scmp.lt.s32.totalorder %s4241_s25, %s4237_s10 }
 0xf3f   : > { %p4239_p4 = pnand %p4238_p13, %p4840_p0 }
 0xf40   : > { %p4244_p7 = por %p4243_p3, %p4242_p6 }
 0xf41   : > { %p4240_p8 = pneg %p4239_p4 }
 0xf43   : > { %p4245_p12 = pnand %p4244_p7, %p4240_p8 }
 0xf45   : > { %4248 = shalt.err (!%p4245_p12)
}
 0xf46   : > { %4020 = dma.vmem_to_hbm [thread:$0]  (%p4840_p0), %s3521_s12, 384, %s3518_s29, %s3506_s19  }
 0xf47 PF: > { %s3532_s21 = sand.u32 1, %s4283_s15   ;;  %p4841_p5 = scmp.ne.s32.totalorder %s4826_s22, 0 }
 0xf48   : > { %p4842_p10 = scmp.ge.s32.totalorder %s4295_s18, 2  ;;  %s3533_s23 = scalar_lea.sflag [#allocation6], %s3532_s21 }
 0xf4a   : > { %p4037_p1 = pnand %p4842_p10, %p4841_p5 }
 0xf4c   : > { %p4038_p2 = pneg %p4037_p1 }
 0xf4e   : > { %4278 = dma.done.wait (%p4038_p2), %s3533_s23, 384  }
 0xf4f   : > { %4280 = vsyncadd (%p4038_p2), %s3533_s23, 4294966912  ;;  %p19_p11 = scmp.ge.s32.totalorder %s4406_s20, 4   ;;  %s4843_s15 = smov %s4287_s16 }
 0xf50   : > { %s4844_s16 = smov %s4291_s17  ;;  %s4845_s17 = smov %s4424_s26 }
 0xf51   : > { %s4846_s18 = smov %s4406_s20  ;;  %21 = sbr.rel (!%p19_p11) target bundleno = 7 (0x7), region = 93 }
 0xf56   :  { %3538 = vsyncpa [#allocation5], 1 }
 0xf57   :  { %3540 = vsyncpa [#allocation5 + $0x1], 1 }
 0xf58   :  { %3541 = vsyncpa [#allocation8], 1 }
 0xf59   :  { %3542 = vsyncpa [#allocation11], 1 }
 0xf5a   :  { %3543 = vsyncpa [#allocation6], 1 }
 0xf5b   :  { %3545 = vsyncpa [#allocation6 + $0x1], 1 }

</bundles_post_ra>
